<compile_context>
chip_gen: v7x
topology: tpu7x:2x2x1
jax: 0.10.0
libtpu: 0.0.40
codegen_flags: <defaults>
</compile_context>

<pallas_src>
import functools

import jax
import jax.numpy as jnp
from jax.experimental import pallas as pl
from jax.experimental.pallas import tpu as pltpu

FEAT_DIM = 512     # backbone output features
NUM_CLASSES = 4    # Linear(1024, 4)
TK_MAX = 2048      # target K-tile width (multiple of 128); 2 MiB bf16 weight
                   # tile -> 4 MiB double-buffered, well under the 32 MiB cap.
NCLS_PAD = 128     # lane-dense padding of the head output


def _cdiv(a, b):
    return -(-a // b)


def _round_up(a, b):
    return _cdiv(a, b) * b


def tsnet_kernel(x0_ref, x1_ref, w_ref, b_ref, wl_ref, out_ref, acc_ref, *, tk):
    """Grid = (backbone, K-tile).

    x0/x1 are full (NP, K_pad) bf16 slabs resident in VMEM; the (tk, 512)
    weight tile is streamed per step.  One backbone's (N, K) @ (K, 512) is
    accumulated over K into an f32 VMEM scratch; bias + ReLU + the padded
    (512, 128) head matmul run at the last K step.  Summing the per-backbone
    head partials outside reconstructs cat(f0, f1) @ Wl.T exactly.
    """
    bb = pl.program_id(0)
    k = pl.program_id(1)

    @pl.when(k == 0)
    def _():
        acc_ref[...] = jnp.zeros_like(acc_ref)

    off = pl.multiple_of(k * tk, tk)

    @pl.when(bb == 0)
    def _():
        acc_ref[...] += jnp.dot(x0_ref[:, pl.ds(off, tk)], w_ref[0],
                                preferred_element_type=jnp.float32)

    @pl.when(bb == 1)
    def _():
        acc_ref[...] += jnp.dot(x1_ref[:, pl.ds(off, tk)], w_ref[0],
                                preferred_element_type=jnp.float32)

    @pl.when(k == pl.num_programs(1) - 1)
    def _():
        feat = jnp.maximum(acc_ref[...] + b_ref[0], 0.0)          # (NP, 512) f32
        out_ref[0] = jnp.dot(feat.astype(jnp.bfloat16), wl_ref[0],
                             preferred_element_type=jnp.float32)  # (NP, 128)


def prepare_params(params, tk_max=TK_MAX):
    """One-time packing (hoisted out of the per-call path): stack the two
    backbones, pick a K-tile (<= tk_max, minimal padding, stored alongside the
    arrays so the forward path cannot disagree), pad K, cast streamed weights
    to bf16, and split/transpose/lane-pad the (4, 1024) head weight."""
    w = jnp.stack([params["w0"], params["w1"]])               # (2, K, 512) f32
    K, feat = w.shape[1], w.shape[2]

    kt = max(1, _cdiv(K, tk_max))
    tk = _round_up(_cdiv(K, kt), 128)                         # tile width
    K_pad = kt * tk
    if K_pad != K:
        w = jnp.pad(w, ((0, 0), (0, K_pad - K), (0, 0)))
    w = w.astype(jnp.bfloat16)                                # (2, K_pad, 512)

    b = jnp.stack([params["b0"], params["b1"]])[:, None, :]   # (2, 1, 512) f32

    wl = params["wl"]                                         # (4, 2*feat)
    half = wl.shape[1] // 2
    assert half == feat
    wl_split = jnp.stack([wl[:, :half].T, wl[:, half:].T])    # (2, 512, 4)
    wl_split = jnp.pad(wl_split, ((0, 0), (0, 0), (0, NCLS_PAD - wl.shape[0])))
    wl_split = wl_split.astype(jnp.bfloat16)                  # (2, 512, 128)

    return dict(arrays=dict(w=w, b=b, wl=wl_split, bl=params["bl"]), tk=tk)


@functools.partial(jax.jit, static_argnames=("tk",))
def _tsnet_forward_jit(x0_nchw, x1_nchw, arrays, *, tk):
    w, b, wl, bl = arrays["w"], arrays["b"], arrays["wl"], arrays["bl"]
    N = x0_nchw.shape[0]
    K_pad, feat = w.shape[1], w.shape[2]
    ncls_pad = wl.shape[2]
    ncls = bl.shape[0]
    kt = K_pad // tk

    # Flatten (== x.view(N, -1) after the backbone conv); pad N to a bf16
    # sublane group (16) and K to the padded weight extent; cast to bf16
    # before padding so no f32 intermediate of the padded slab is written.
    NP = max(16, _round_up(N, 16))

    def prep_x(x):
        xf = x.reshape(N, -1)
        return jnp.pad(xf.astype(jnp.bfloat16),
                       ((0, NP - N), (0, K_pad - xf.shape[1])))

    x0 = prep_x(x0_nchw)                                      # (NP, K_pad) bf16
    x1 = prep_x(x1_nchw)

    cost = pl.CostEstimate(
        flops=2 * (2 * NP * K_pad * feat) + 2 * (2 * NP * feat * ncls_pad),
        transcendentals=0,
        bytes_accessed=(w.size * 2 + x0.size * 2 + x1.size * 2
                        + b.size * 4 + wl.size * 2 + 2 * NP * ncls_pad * 4),
    )

    kernel = functools.partial(tsnet_kernel, tk=tk)

    partial_out = pl.pallas_call(
        kernel,
        out_shape=jax.ShapeDtypeStruct((2, NP, ncls_pad), jnp.float32),
        grid_spec=pltpu.PrefetchScalarGridSpec(
            num_scalar_prefetch=0,
            grid=(2, kt),
            in_specs=[
                pl.BlockSpec((NP, K_pad), lambda bb, k: (0, 0)),          # x0 (resident)
                pl.BlockSpec((NP, K_pad), lambda bb, k: (0, 0)),          # x1 (resident)
                pl.BlockSpec((1, tk, feat), lambda bb, k: (bb, k, 0)),    # W (streamed)
                pl.BlockSpec((1, 1, feat), lambda bb, k: (bb, 0, 0)),     # bias
                pl.BlockSpec((1, feat, ncls_pad), lambda bb, k: (bb, 0, 0)),  # head W
            ],
            out_specs=pl.BlockSpec((1, NP, ncls_pad), lambda bb, k: (bb, 0, 0)),
            scratch_shapes=[pltpu.VMEM((NP, feat), jnp.float32)],
        ),
        compiler_params=pltpu.CompilerParams(
            dimension_semantics=("parallel", "arbitrary"),
            vmem_limit_bytes=32 * 1024 * 1024),
        cost_estimate=cost,
    )(x0, x1, w, b, wl)

    # cat(f0, f1) @ Wl.T == f0 @ Wl0 + f1 @ Wl1 ; sum the per-backbone head
    # partials, add the head bias, drop the N / class padding.
    # Dropout(p=0.5) in eval mode is the identity.
    return partial_out[0, :N, :ncls] + partial_out[1, :N, :ncls] + bl


def tsnet_forward(x0_nchw, x1_nchw, prep):
    """x0_nchw, x1_nchw: (N, C, H, W) float32. Returns (N, 4) float32."""
    return _tsnet_forward_jit(x0_nchw, x1_nchw, prep["arrays"], tk=prep["tk"])


def init_params(key, in_features, feat_dim=FEAT_DIM, num_classes=NUM_CLASSES):
    ks = jax.random.split(key, 6)
    s_in = 1.0 / jnp.sqrt(in_features)
    s_ft = 1.0 / jnp.sqrt(2 * feat_dim)
    return dict(
        w0=jax.random.uniform(ks[0], (in_features, feat_dim), jnp.float32, -s_in, s_in),
        b0=jax.random.uniform(ks[1], (feat_dim,), jnp.float32, -s_in, s_in),
        w1=jax.random.uniform(ks[2], (in_features, feat_dim), jnp.float32, -s_in, s_in),
        b1=jax.random.uniform(ks[3], (feat_dim,), jnp.float32, -s_in, s_in),
        # Linear_layer = nn.Linear(1024, 4): weight (4, 1024), bias (4,)
        wl=jax.random.uniform(ks[4], (num_classes, 2 * feat_dim), jnp.float32, -s_ft, s_ft),
        bl=jax.random.uniform(ks[5], (num_classes,), jnp.float32, -s_ft, s_ft),
    )


def tsnet_reference(x0_nchw, x1_nchw, params):
    """Pure-JAX f32 reference matching the original module semantics."""
    N = x0_nchw.shape[0]
    x0 = x0_nchw.reshape(N, -1)
    x1 = x1_nchw.reshape(N, -1)
    f0 = jnp.maximum(x0 @ params["w0"] + params["b0"], 0.0)
    f1 = jnp.maximum(x1 @ params["w1"] + params["b1"], 0.0)
    cat = jnp.concatenate([f0, f1], axis=1)                    # (N, 1024)
    return cat @ params["wl"].T + params["bl"]                 # (N, 4)


def tsnet_reference_quant(x0_nchw, x1_nchw, params):
    """Reference quantized the way the kernel streams (bf16 x / W / feat)."""
    bf = lambda a: a.astype(jnp.bfloat16).astype(jnp.float32)
    N = x0_nchw.shape[0]
    x0 = bf(x0_nchw.reshape(N, -1))
    x1 = bf(x1_nchw.reshape(N, -1))
    f0 = jnp.maximum(x0 @ bf(params["w0"]) + params["b0"], 0.0)
    f1 = jnp.maximum(x1 @ bf(params["w1"]) + params["b1"], 0.0)
    cat = bf(jnp.concatenate([f0, f1], axis=1))
    return cat @ bf(params["wl"]).T + params["bl"]


if __name__ == "__main__":
    key = jax.random.PRNGKey(0)
    k_in0, k_in1, k_p = jax.random.split(key, 3)

    N, C, H, W = 2, 4, 16, 16
    x0 = jax.random.normal(k_in0, (N, C, H, W), jnp.float32)
    x1 = jax.random.normal(k_in1, (N, C, H, W), jnp.float32)

    params = init_params(k_p, in_features=C * H * W)
    prep = prepare_params(params)

    out = jax.block_until_ready(tsnet_forward(x0, x1, prep))
    assert out.shape == (N, NUM_CLASSES) and out.dtype == jnp.float32

    ref_q = tsnet_reference_quant(x0, x1, params)
    ref_f32 = tsnet_reference(x0, x1, params)

    assert jnp.allclose(out, ref_q, atol=2e-2, rtol=2e-2), \
        f"max diff vs quantized ref: {jnp.max(jnp.abs(out - ref_q))}"
    assert jnp.allclose(out, ref_f32, atol=5e-2, rtol=5e-2), \
        f"max diff vs f32 ref: {jnp.max(jnp.abs(out - ref_f32))}"

    print("KERNEL_OK")
</pallas_src>

<mosaic_0001>
module attributes {stable_mosaic.version = 11 : i64} {
  func.func @tsnet_kernel(%arg0: i32, %arg1: i32, %arg2: memref<16x1024xbf16, #tpu.memory_space<vmem>>, %arg3: memref<16x1024xbf16, #tpu.memory_space<vmem>>, %arg4: memref<1x1024x512xbf16, #tpu.memory_space<vmem>>, %arg5: memref<1x1x512xf32, #tpu.memory_space<vmem>>, %arg6: memref<1x512x128xbf16, #tpu.memory_space<vmem>>, %arg7: memref<1x16x128xf32, #tpu.memory_space<vmem>>, %arg8: memref<16x512xf32, #tpu.memory_space<vmem>>) attributes {dimension_semantics = [#tpu.dimension_semantics<parallel>, #tpu.dimension_semantics<arbitrary>], iteration_bounds = array<i64: 2, 1>, scalar_prefetch = 0 : i64, scratch_operands = 1 : i64, tpu.core_type = #tpu.core_type<tc>, window_params = [{pipeline_mode = #tpu.pipeline_mode<synchronous>, transform_indices = @transform_0, window_bounds = array<i64: 16, 1024>}, {pipeline_mode = #tpu.pipeline_mode<synchronous>, transform_indices = @transform_1, window_bounds = array<i64: 16, 1024>}, {transform_indices = @transform_2, window_bounds = array<i64: 1, 1024, 512>}, {transform_indices = @transform_3, window_bounds = array<i64: 1, 1, 512>}, {transform_indices = @transform_4, window_bounds = array<i64: 1, 512, 128>}, {transform_indices = @transform_5, window_bounds = array<i64: 1, 16, 128>}]} {
    %c0_i32 = arith.constant 0 : i32
    %0 = arith.cmpi eq, %arg1, %c0_i32 : i32
    %1 = arith.extui %0 : i1 to i32
    %c0_i32_0 = arith.constant 0 : i32
    %2 = arith.cmpi ne, %1, %c0_i32_0 : i32
    scf.if %2 {
      %cst = arith.constant 0.000000e+00 : f32
      %14 = vector.broadcast %cst : f32 to vector<16x512xf32>
      %c0 = arith.constant 0 : index
      %c0_6 = arith.constant 0 : index
      %15 = vector.load %arg8[%c0, %c0_6] : memref<16x512xf32, #tpu.memory_space<vmem>>, vector<16x512xf32>
      tpu.vector_store %arg8[%c0, %c0_6], %14 {strides = array<i32>} : memref<16x512xf32, #tpu.memory_space<vmem>>, vector<16x512xf32>,
    } else {
    }
    %c1024_i32 = arith.constant 1024 : i32
    %3 = arith.muli %arg1, %c1024_i32 : i32
    %4 = tpu.assume_multiple %3, 1024 : i32
    %c0_i32_1 = arith.constant 0 : i32
    %5 = arith.cmpi eq, %arg0, %c0_i32_1 : i32
    %6 = arith.extui %5 : i1 to i32
    %c0_i32_2 = arith.constant 0 : i32
    %7 = arith.cmpi ne, %6, %c0_i32_2 : i32
    scf.if %7 {
      %c0 = arith.constant 0 : index
      %c0_6 = arith.constant 0 : index
      %14 = vector.load %arg8[%c0, %c0_6] : memref<16x512xf32, #tpu.memory_space<vmem>>, vector<16x512xf32>
      %c0_7 = arith.constant 0 : index
      %15 = arith.index_cast %4 : i32 to index
      %16 = vector.load %arg2[%c0_7, %15] : memref<16x1024xbf16, #tpu.memory_space<vmem>>, vector<16x1024xbf16>
      %c0_8 = arith.constant 0 : index
      %c0_9 = arith.constant 0 : index
      %c0_10 = arith.constant 0 : index
      %17 = vector.load %arg4[%c0_8, %c0_9, %c0_10] : memref<1x1024x512xbf16, #tpu.memory_space<vmem>>, vector<1x1024x512xbf16>
      %18 = vector.shape_cast %17 : vector<1x1024x512xbf16> to vector<1024x512xbf16>
      %cst = arith.constant dense<0.000000e+00> : vector<16x512xf32>
      %19 = tpu.matmul %16, %18, %cst {dimension_numbers = #tpu.dot_dimension_numbers<[1], [0], [0], [1], [0, 0, 1, 1], [], []>} : vector<16x1024xbf16>, vector<1024x512xbf16>, vector<16x512xf32> -> vector<16x512xf32>
      %20 = arith.addf %14, %19 : vector<16x512xf32>
      %c0_11 = arith.constant 0 : index
      %c0_12 = arith.constant 0 : index
      %21 = vector.load %arg8[%c0_11, %c0_12] : memref<16x512xf32, #tpu.memory_space<vmem>>, vector<16x512xf32>
      tpu.vector_store %arg8[%c0_11, %c0_12], %20 {strides = array<i32>} : memref<16x512xf32, #tpu.memory_space<vmem>>, vector<16x512xf32>,
    } else {
    }
    %c1_i32 = arith.constant 1 : i32
    %8 = arith.cmpi eq, %arg0, %c1_i32 : i32
    %9 = arith.extui %8 : i1 to i32
    %c0_i32_3 = arith.constant 0 : i32
    %10 = arith.cmpi ne, %9, %c0_i32_3 : i32
    scf.if %10 {
      %c0 = arith.constant 0 : index
      %c0_6 = arith.constant 0 : index
      %14 = vector.load %arg8[%c0, %c0_6] : memref<16x512xf32, #tpu.memory_space<vmem>>, vector<16x512xf32>
      %c0_7 = arith.constant 0 : index
      %15 = arith.index_cast %4 : i32 to index
      %16 = vector.load %arg3[%c0_7, %15] : memref<16x1024xbf16, #tpu.memory_space<vmem>>, vector<16x1024xbf16>
      %c0_8 = arith.constant 0 : index
      %c0_9 = arith.constant 0 : index
      %c0_10 = arith.constant 0 : index
      %17 = vector.load %arg4[%c0_8, %c0_9, %c0_10] : memref<1x1024x512xbf16, #tpu.memory_space<vmem>>, vector<1x1024x512xbf16>
      %18 = vector.shape_cast %17 : vector<1x1024x512xbf16> to vector<1024x512xbf16>
      %cst = arith.constant dense<0.000000e+00> : vector<16x512xf32>
      %19 = tpu.matmul %16, %18, %cst {dimension_numbers = #tpu.dot_dimension_numbers<[1], [0], [0], [1], [0, 0, 1, 1], [], []>} : vector<16x1024xbf16>, vector<1024x512xbf16>, vector<16x512xf32> -> vector<16x512xf32>
      %20 = arith.addf %14, %19 : vector<16x512xf32>
      %c0_11 = arith.constant 0 : index
      %c0_12 = arith.constant 0 : index
      %21 = vector.load %arg8[%c0_11, %c0_12] : memref<16x512xf32, #tpu.memory_space<vmem>>, vector<16x512xf32>
      tpu.vector_store %arg8[%c0_11, %c0_12], %20 {strides = array<i32>} : memref<16x512xf32, #tpu.memory_space<vmem>>, vector<16x512xf32>,
    } else {
    }
    %c0_i32_4 = arith.constant 0 : i32
    %11 = arith.cmpi eq, %arg1, %c0_i32_4 : i32
    %12 = arith.extui %11 : i1 to i32
    %c0_i32_5 = arith.constant 0 : i32
    %13 = arith.cmpi ne, %12, %c0_i32_5 : i32
    scf.if %13 {
      %c0 = arith.constant 0 : index
      %c0_6 = arith.constant 0 : index
      %14 = vector.load %arg8[%c0, %c0_6] : memref<16x512xf32, #tpu.memory_space<vmem>>, vector<16x512xf32>
      %c0_7 = arith.constant 0 : index
      %c0_8 = arith.constant 0 : index
      %c0_9 = arith.constant 0 : index
      %15 = vector.load %arg5[%c0_7, %c0_8, %c0_9] : memref<1x1x512xf32, #tpu.memory_space<vmem>>, vector<1x1x512xf32>
      %16 = vector.shape_cast %15 : vector<1x1x512xf32> to vector<1x512xf32>
      %17 = vector.broadcast %16 : vector<1x512xf32> to vector<16x512xf32>
      %18 = arith.addf %14, %17 : vector<16x512xf32>
      %cst = arith.constant 0.000000e+00 : f32
      %19 = vector.broadcast %cst : f32 to vector<16x512xf32>
      %20 = arith.maximumf %18, %19 : vector<16x512xf32>
      %21 = arith.truncf %20 : vector<16x512xf32> to vector<16x512xbf16>
      %c0_10 = arith.constant 0 : index
      %c0_11 = arith.constant 0 : index
      %c0_12 = arith.constant 0 : index
      %22 = vector.load %arg6[%c0_10, %c0_11, %c0_12] : memref<1x512x128xbf16, #tpu.memory_space<vmem>>, vector<1x512x128xbf16>
      %23 = vector.shape_cast %22 : vector<1x512x128xbf16> to vector<512x128xbf16>
      %cst_13 = arith.constant dense<0.000000e+00> : vector<16x128xf32>
      %24 = tpu.matmul %21, %23, %cst_13 {dimension_numbers = #tpu.dot_dimension_numbers<[1], [0], [0], [1], [0, 0, 1, 1], [], []>} : vector<16x512xbf16>, vector<512x128xbf16>, vector<16x128xf32> -> vector<16x128xf32>
      %c0_14 = arith.constant 0 : index
      %c0_15 = arith.constant 0 : index
      %c0_16 = arith.constant 0 : index
      %25 = vector.load %arg7[%c0_14, %c0_15, %c0_16] : memref<1x16x128xf32, #tpu.memory_space<vmem>>, vector<1x16x128xf32>
      %26 = vector.shape_cast %25 : vector<1x16x128xf32> to vector<16x128xf32>
      %27 = vector.shape_cast %24 : vector<16x128xf32> to vector<1x16x128xf32>
      tpu.vector_store %arg7[%c0_14, %c0_15, %c0_16], %27 {strides = array<i32>} : memref<1x16x128xf32, #tpu.memory_space<vmem>>, vector<1x16x128xf32>,
    } else {
    }
    return
  }
  func.func @transform_0(%arg0: i32, %arg1: i32) -> (i32, i32) {
    %c0_i32 = arith.constant 0 : i32
    %c0_i32_0 = arith.constant 0 : i32
    %c0_i32_1 = arith.constant 0 : i32
    return %c0_i32, %c0_i32_0 : i32, i32
  }
  func.func @transform_1(%arg0: i32, %arg1: i32) -> (i32, i32) {
    %c0_i32 = arith.constant 0 : i32
    %c0_i32_0 = arith.constant 0 : i32
    %c0_i32_1 = arith.constant 0 : i32
    return %c0_i32, %c0_i32_0 : i32, i32
  }
  func.func @transform_2(%arg0: i32, %arg1: i32) -> (i32, i32, i32) {
    %c0_i32 = arith.constant 0 : i32
    %c0_i32_0 = arith.constant 0 : i32
    return %arg0, %arg1, %c0_i32 : i32, i32, i32
  }
  func.func @transform_3(%arg0: i32, %arg1: i32) -> (i32, i32, i32) {
    %c0_i32 = arith.constant 0 : i32
    %c0_i32_0 = arith.constant 0 : i32
    %c0_i32_1 = arith.constant 0 : i32
    return %arg0, %c0_i32, %c0_i32_0 : i32, i32, i32
  }
  func.func @transform_4(%arg0: i32, %arg1: i32) -> (i32, i32, i32) {
    %c0_i32 = arith.constant 0 : i32
    %c0_i32_0 = arith.constant 0 : i32
    %c0_i32_1 = arith.constant 0 : i32
    return %arg0, %c0_i32, %c0_i32_0 : i32, i32, i32
  }
  func.func @transform_5(%arg0: i32, %arg1: i32) -> (i32, i32, i32) {
    %c0_i32 = arith.constant 0 : i32
    %c0_i32_0 = arith.constant 0 : i32
    %c0_i32_1 = arith.constant 0 : i32
    return %arg0, %c0_i32, %c0_i32_0 : i32, i32, i32
  }
}

</mosaic_0001>

<bundles_post_ra>
// kernel: _tsnet_forward_jit.1
= control target key start
LH: loop header
LB: loop body
LE: loop exit
PB: predicated region body
PF: predicated region fallthrough
CT: control target
= control target key end

     0   :  { %s7380_s0 = inlined_call_operand.vmem [shape: bf16[16,1024], index: 0, kind: input, shape index: {}]   ;;  %s7381_s1 = inlined_call_operand.vmem [shape: bf16[16,1024], index: 1, kind: input, shape index: {}]   ;;  %s7382_s2 = inlined_call_operand.hbm [shape: bf16[2,1024,512], index: 2, kind: input, shape index: {}]   ;;  %s7383_s3 = inlined_call_operand.hbm [shape: f32[2,1,512], index: 3, kind: input, shape index: {}]   ;;  %s7384_s4 = inlined_call_operand.hbm [shape: bf16[2,512,128], index: 4, kind: input, shape index: {}]   ;;  %s7385_s5 = inlined_call_operand.vmem [shape: f32[2,16,128], index: 5, kind: output, shape index: {}]  }
   0x1   :  { %7388 = sst [smem:[#allocation10_spill]] %s7382_s2 }
   0x2   :  { %10 = vsyncpa [#allocation4], 0 }
   0x3   :  { %12 = vsyncpa [#allocation4 + $0x1], 0 }
   0x4   :  { %13 = vsyncpa [#allocation6], 0 }
   0x5   :  { %15 = vsyncpa [#allocation6 + $0x1], 0  ;;  %s6523_s18 = smov 0   ;;  %s6525_s19 = smov 0  }
   0x6   :  { %s6527_s20 = smov 0   ;;  %s6529_s21 = smov 0  }
   0x7   :  { %s6531_s22 = smov 0   ;;  %s6533_s23 = smov 0  }
   0x8 LB: > { %s7387_s24 = sadd.s32 4294967295, %s6483_s23   ;;  %s33_s25 = sadd.s32 1, %s6479_s22  ;;  %s6483_s23 = sphi %s6533_s23, %s21_s23   ;;  %s6479_s22 = sphi %s6531_s22, %s7401_s22   ;;  %s6475_s21 = sphi %s6529_s21, %s7400_s21   ;;  %s6471_s20 = sphi %s6527_s20, %s7399_s20   ;;  %s6467_s19 = sphi %s6525_s19, %s7398_s19   ;;  %s6463_s18 = sphi %s6523_s18, %s7397_s18  }
   0x9   : > { %p35_p0 = scmp.ge.s32.totalorder %s33_s25, 2  ;;  %s84_s26 = sadd.s32 1, %s6471_s20 }
   0xa   : > { %p91_p1 = scmp.ne.s32.totalorder %s6471_s20, %s6467_s19  ;;  %p92_p2 = scmp.eq.s32.totalorder %s6483_s23, 0 }
   0xb   : > { %s7403_s25 = smov (%p35_p0, %s33_s25), 0  ;;  %p97_p4 = scmp.ne.s32.totalorder %s6467_s19, %s6463_s18 }
   0xc   : > { %p93_p3 = por %p92_p2, %p91_p1  ;;  %s79_s27 = ssub.s32 %s6479_s22, %s7403_s25 }
   0xd   : > { %p98_p5 = scmp.eq.s32.totalorder %s7387_s24, 0  ;;  %p82_p6 = scmp.eq.s32.totalorder %s79_s27, 0 }
   0xe   : > { %p5485_p8 = scmp.lt.s32.totalorder %s6483_s23, 2  ;;  %s6573_s30 = sand.u32 1, %s6471_s20  }
   0xf   : > { %p6564_p7 = por %p98_p5, %p97_p4  ;;  %s229_s7 = sand.u32 1, %s6483_s23  }
  0x10   : > { %s6570_s29 = scalar_select %p82_p6, %s6471_s20, %s84_s26  }
  0x11   : > { %s7389_s28 = scalar_select %p6564_p7, 1, 0 }
  0x12   : > { %p6575_p9 = pnand %p5485_p8, %p93_p3  ;;  %s4797_s8 = sshll.u32 %s6573_s30, 2 }
  0x13   : > { %s5374_s9 = sshll.u32 %s6479_s22, 6  ;;  %s233_s13 = scalar_lea.vmem [#allocation5], %s4797_s8 }
  0x14   : > { %s6585_s12 = scalar_lea.hbm %s7383_s3, %s5374_s9  ;;  %s241_s14 = sshll.u32 %s233_s13, 4  ;;  %s6587_s14 = int_to_ptr.vmem [resolvable:$true] %s241_s14 }
  0x15   : > { %s4800_s15 = sshll.u32 %s6573_s30, 8  ;;  %s6590_s16 = scalar_lea.sflag [#allocation6], %s229_s7 }
  0x16   : > { %s6339_s17 = scalar_lea.hbm %s6585_s12, 64  ;;  %p6596_p11 = pneg %p6575_p9 }
  0x17   : > { %p6340_p10 = scmp.ne.s32.totalorder %s6585_s12, %s6339_s17  ;;  %s6344_s8 = scalar_lea.hbm %s7383_s3, 128 }
  0x18   : > { %p6345_p0 = scmp.lt.u32.totalorder %s6585_s12, %s7383_s3  ;;  %p6346_p1 = scmp.lt.u32.totalorder %s6344_s8, %s6339_s17 }
  0x19   : > { %p6342_p12 = pnand %p6596_p11, %p6340_p10  ;;  %p6348_p3 = scmp.lt.u32.totalorder %s6339_s17, %s6585_s12 }
  0x1a   : > { %p6347_p2 = por %p6346_p1, %p6345_p0 }
  0x1b   : > { %p6343_p13 = pneg %p6342_p12 }
  0x1c   : > { %p6349_p4 = por %p6348_p3, %p6347_p2 }
  0x1e   : > { %p6350_p5 = pnand %p6349_p4, %p6343_p13 }
  0x20   : > { %6353 = shalt.err (!%p6350_p5)
}
  0x21   : > { %s6354_s7 = scalar_lea.vmem %s6587_s14, 64  ;;  %s6485_s11 = smov [#allocation5]  }
  0x22   : > { %p6355_p6 = scmp.ne.s32.totalorder %s6587_s14, %s6354_s7  ;;  %s6359_s13 = sshll.u32 %s6485_s11, 4  ;;  %s6360_s13 = int_to_ptr.vmem [resolvable:$false] %s6359_s13 }
  0x23   : > { %s6361_s26 = scalar_lea.vmem %s6360_s13, 128  ;;  %p6362_p12 = scmp.lt.s32.totalorder %s6587_s14, %s6360_s13 }
  0x24   : > { %p6357_p8 = pnand %p6355_p6, %p6596_p11  ;;  %p6363_p7 = scmp.lt.s32.totalorder %s6361_s26, %s6354_s7 }
  0x26   : > { %p6358_p10 = pneg %p6357_p8  ;;  %p6364_p0 = por %p6363_p7, %p6362_p12 }
  0x28   : > { %p6365_p1 = pnand %p6364_p0, %p6358_p10 }
  0x2a   : > { %6368 = shalt.err (!%p6365_p1)
}
  0x2b   : > { %5481 = dma.hbm_to_vmem [thread:$0]  (!%p6575_p9), %s6585_s12, 64, %s6587_s14, %s6590_s16  }
  0x2c   : > { %p4803_p13 = scmp.ge.s32.totalorder %s6483_s23, 1  ;;  %p267_p2 = scmp.lt.s32.totalorder %s6483_s23, 3 }
  0x2d   : > { %s4794_s27 = sshll.u32 %s6573_s30, 11  ;;  %s5373_s8 = sshll.u32 %s6479_s22, 15 }
  0x2e   : > { %p6622_p3 = pnand %p4803_p13, %p267_p2  ;;  %s7393_s2 = sld [smem:[#allocation10_spill]] }
  0x2f   : > { %s209_s11 = scalar_lea.vmem [#allocation3], %s4794_s27  ;;  %s206_s12 = scalar_lea.sflag [#allocation4], %s6573_s30 }
  0x30   : > { %s7392_s17 = scalar_select %p6622_p3, 1, 0 }
  0x31   : > { %s219_s13 = sshll.u32 %s209_s11, 4  ;;  %s6633_s13 = int_to_ptr.vmem [resolvable:$true] %s219_s13 }
  0x34   : > { %s6631_s7 = scalar_lea.hbm %s7393_s2, %s5373_s8  ;;  %s6374_s9 = scalar_lea.hbm %s7393_s2, 65536 }
  0x35   : > { %s6369_s14 = scalar_lea.hbm %s6631_s7, 32768  ;;  %p6375_p6 = scmp.lt.u32.totalorder %s6631_s7, %s7393_s2 }
  0x36   : > { %p6370_p7 = scmp.ne.s32.totalorder %s6631_s7, %s6369_s14  ;;  %p6376_p8 = scmp.lt.u32.totalorder %s6374_s9, %s6369_s14 }
  0x37   : > { %p6378_p12 = scmp.lt.u32.totalorder %s6369_s14, %s6631_s7 }
  0x38   : > { %p6372_p4 = pnand %p6370_p7, %p6596_p11  ;;  %p6377_p10 = por %p6376_p8, %p6375_p6 }
  0x3a   : > { %p6373_p5 = pneg %p6372_p4  ;;  %p6379_p0 = por %p6378_p12, %p6377_p10 }
  0x3c   : > { %p6380_p1 = pnand %p6379_p0, %p6373_p5 }
  0x3e   : > { %6383 = shalt.err (!%p6380_p1)
}
  0x3f   : > { %s6384_s27 = scalar_lea.vmem %s6633_s13, 32768  ;;  %s6486_s24 = smov [#allocation3]  }
  0x40   : > { %p6385_p13 = scmp.ne.s32.totalorder %s6633_s13, %s6384_s27  ;;  %s6389_s11 = sshll.u32 %s6486_s24, 4  ;;  %s6390_s11 = int_to_ptr.vmem [resolvable:$false] %s6389_s11 }
  0x41   : > { %s6391_s26 = scalar_lea.vmem %s6390_s11, 65536  ;;  %p6392_p4 = scmp.lt.s32.totalorder %s6633_s13, %s6390_s11 }
  0x42   : > { %p6387_p2 = pnand %p6385_p13, %p6596_p11  ;;  %p6393_p3 = scmp.lt.s32.totalorder %s6391_s26, %s6384_s27 }
  0x44   : > { %p6388_p7 = pneg %p6387_p2  ;;  %p6394_p6 = por %p6393_p3, %p6392_p4 }
  0x46   : > { %p6395_p8 = pnand %p6394_p6, %p6388_p7 }
  0x48   : > { %6398 = shalt.err (!%p6395_p8)
}
  0x49   : > { %s6487_s14 = smov 256   ;;  %s6488_s9 = smov 16  }
  0x4a   : > { %5478 = dma.hbm_to_vmem [thread:$0]  (!%p6575_p9), %s6631_s7, 32768, %s6633_s13, %s206_s12, %s6487_s14, %s6487_s14, %s6488_s9  }
  0x4b   : > { %s5375_s8 = sshll.u32 %s6479_s22, 12  ;;  %s252_s11 = scalar_lea.vmem [#allocation7], %s4800_s15 }
  0x4c   : > { %s6663_s27 = scalar_lea.hbm %s7384_s4, %s5375_s8  ;;  %s259_s26 = sshll.u32 %s252_s11, 4  ;;  %s6667_s26 = int_to_ptr.vmem [resolvable:$true] %s259_s26 }
  0x4d   : > { %s6399_s2 = scalar_lea.hbm %s6663_s27, 4096  ;;  %s6404_s12 = scalar_lea.hbm %s7384_s4, 8192 }
  0x4e   : > { %p6400_p3 = scmp.ne.s32.totalorder %s6663_s27, %s6399_s2  ;;  %p6405_p12 = scmp.lt.u32.totalorder %s6663_s27, %s7384_s4 }
  0x4f   : > { %p6406_p0 = scmp.lt.u32.totalorder %s6404_s12, %s6399_s2  ;;  %p6408_p13 = scmp.lt.u32.totalorder %s6399_s2, %s6663_s27 }
  0x50   : > { %p6402_p5 = pnand %p6400_p3, %p6596_p11 }
  0x51   : > { %p6407_p1 = por %p6406_p0, %p6405_p12 }
  0x52   : > { %p6403_p10 = pneg %p6402_p5 }
  0x53   : > { %p6409_p2 = por %p6408_p13, %p6407_p1 }
  0x55   : > { %p6410_p7 = pnand %p6409_p2, %p6403_p10 }
  0x57   : > { %6413 = shalt.err (!%p6410_p7)
}
  0x58   : > { %s6414_s30 = scalar_lea.vmem %s6667_s26, 4096  ;;  %s6489_s15 = smov [#allocation7]  }
  0x59   : > { %p6415_p4 = scmp.ne.s32.totalorder %s6667_s26, %s6414_s30  ;;  %s6419_s8 = sshll.u32 %s6489_s15, 4  ;;  %s6420_s8 = int_to_ptr.vmem [resolvable:$false] %s6419_s8 }
  0x5a   : > { %s6421_s10 = scalar_lea.vmem %s6420_s8, 8192  ;;  %p6422_p3 = scmp.lt.s32.totalorder %s6667_s26, %s6420_s8 }
  0x5b   : > { %p6417_p6 = pnand %p6415_p4, %p6596_p11  ;;  %p6423_p5 = scmp.lt.s32.totalorder %s6421_s10, %s6414_s30 }
  0x5d   : > { %p6418_p8 = pneg %p6417_p6  ;;  %p6424_p12 = por %p6423_p5, %p6422_p3 }
  0x5f   : > { %p6425_p0 = pnand %p6424_p12, %p6418_p8 }
  0x61   : > { %6428 = shalt.err (!%p6425_p0)
}
  0x62   : > { %s6490_s2 = smov 64   ;;  %s6491_s24 = smov 4  }
  0x63   : > { %5484 = dma.hbm_to_vmem [thread:$0]  (!%p6575_p9), %s6663_s27, 4096, %s6667_s26, %s6590_s16, %s6490_s2, %s6490_s2, %s6491_s24  }
  0x64   : > { %p7394_p11 = scmp.ne.s32.totalorder %s7392_s17, 0 }
  0x65   : > { %s273_s18 = sand.u32 (!%p7394_p11), 1, %s6467_s19   ;;  %p7395_p10 = scmp.ne.s32.totalorder (!%p7394_p11), %s7389_s28, 0 }
  0x66   : > { %271 = sbr.rel (%p7394_p11) target bundleno = 1324 (0x52c), region = 40  ;;  %s4804_s11 = sshll.u32 (!%p7394_p11), %s273_s18, 11 }
  0x67   : > { %s274_s7 = scalar_lea.sflag (!%p7394_p11), [#allocation4], %s273_s18  ;;  %s6694_s13 = scalar_lea.vmem (!%p7394_p11), [#allocation3], %s4804_s11 }
  0x6d   : > { %6454 = dma.done.wait (%p7395_p10), %s274_s7, 32768  }
  0x6e   : > { %6456 = vsyncadd (%p7395_p10), %s274_s7, 4294934528  ;;  %s7396_s12 = sadd.s32 4294967295, %s6483_s23   ;;  %s4805_s16 = sshll.u32 %s273_s18, 2 }
  0x6f   : > { %s282_s6 = sand.u32 1, %s7396_s12   ;;  %s6702_s17 = scalar_lea.vmem [#allocation5], %s4805_s16 }
  0x70   : > { %s283_s27 = scalar_lea.sflag [#allocation6], %s282_s6 }
  0x71   : > { %6458 = dma.done.wait (%p7395_p10), %s283_s27, 4160  }
  0x72   : > { %6460 = vsyncadd (%p7395_p10), %s283_s27, 4294963136  ;;  %s4806_s26 = sshll.u32 %s273_s18, 8  ;;  %p333_p9 = scmp.lt.s32.totalorder %s6475_s21, 1  ;;  %v6492_v0 = vmov 0.0  }
  0x73   : > { %343 = vst [vmem:[#allocation2] sm:$0xff] %v6492_v0  ;;  %344 = vst [vmem:[#allocation2 + $0x8] sm:$0xff] %v6492_v0  ;;  %s6715_s8 = scalar_lea.vmem [#allocation7], %s4806_s26  ;;  %p4809_p1 = scmp.ne.s32.totalorder %s6475_s21, 0 }
  0x74   : > { %345 = vst [vmem:[#allocation2 + $0x10] sm:$0xff] %v6492_v0  ;;  %346 = vst [vmem:[#allocation2 + $0x18] sm:$0xff] %v6492_v0  ;;  %s334_s14 = scalar_select %p333_p9, %s6475_s21, 1 }
  0x75   : > { %347 = vst [vmem:[#allocation2 + $0x20] sm:$0xff] %v6492_v0  ;;  %348 = vst [vmem:[#allocation2 + $0x28] sm:$0xff] %v6492_v0  ;;  %355 = sbr.rel (%p4809_p1) target bundleno = 593 (0x251), region = 60  ;;  %v5539_v1 = vld [vmem:[%s6694_s13 + $0x4] ss:$16 sps:$4 sm:$0xff] (!%p4809_p1)  }
  0x76   : > { %349 = vst [vmem:[#allocation2 + $0x30] sm:$0xff] %v6492_v0  ;;  %350 = vst [vmem:[#allocation2 + $0x38] sm:$0xff] %v6492_v0  ;;  %s5376_s9 = sshll.u32 %s334_s14, 4  ;;  %v5541_v2 = vld [vmem:[%s6694_s13 + $0xc] ss:$16 sps:$4 sm:$0xff] (!%p4809_p1)   ;;  %1952 = vmatprep.subr.bf16.mxu0 (!%p4809_p1), %v5539_v1  ;;  %v368_v47 = vld [vmem:[%s7380_s0] sm:$0xff] (!%p4809_p1) }
  0x77   : > { %s6713_s28 = scalar_lea.vmem %s7385_s5, %s5376_s9  ;;  %v5543_v3 = vld [vmem:[%s6694_s13] ss:$16 sps:$4 sm:$0xff] (!%p4809_p1)   ;;  %v5544_v4 = vld [vmem:[%s6694_s13 + $0x8] ss:$16 sps:$4 sm:$0xff] (!%p4809_p1)   ;;  %2124 = vmatprep.subr.bf16.mxu1 (!%p4809_p1), %v5541_v2  ;;  %v5545_v5 = vld [vmem:[%s6694_s13 + $0x24] ss:$16 sps:$4 sm:$0xff] (!%p4809_p1)  }
  0x78   : > { %1953 = vmatpush1.bf16.msra.mxu0 (!%p4809_p1), %v5543_v3  ;;  %2125 = vmatpush1.bf16.msra.mxu1 (!%p4809_p1), %v5544_v4  ;;  %v5547_v6 = vld [vmem:[%s6694_s13 + $0x2c] ss:$16 sps:$4 sm:$0xff] (!%p4809_p1)   ;;  %v5549_v7 = vld [vmem:[%s6694_s13 + $0x20] ss:$16 sps:$4 sm:$0xff] (!%p4809_p1)   ;;  %v5550_v8 = vld [vmem:[%s6694_s13 + $0x28] ss:$16 sps:$4 sm:$0xff] (!%p4809_p1)  }
  0x79   : > { %1954 = vmatprep.subr.bf16.mxu0 (!%p4809_p1), %v5545_v5  ;;  %2126 = vmatprep.subr.bf16.mxu1 (!%p4809_p1), %v5547_v6  ;;  %v5551_v9 = vld [vmem:[%s6694_s13 + $0x44] ss:$16 sps:$4 sm:$0xff] (!%p4809_p1)   ;;  %v5553_v10 = vld [vmem:[%s6694_s13 + $0x4c] ss:$16 sps:$4 sm:$0xff] (!%p4809_p1)   ;;  %v5555_v11 = vld [vmem:[%s6694_s13 + $0x40] ss:$16 sps:$4 sm:$0xff] (!%p4809_p1)  }
  0x7a   : > { %v5556_v12 = vld [vmem:[%s6694_s13 + $0x48] ss:$16 sps:$4 sm:$0xff] (!%p4809_p1)   ;;  %v5557_v13 = vld [vmem:[%s6694_s13 + $0x64] ss:$16 sps:$4 sm:$0xff] (!%p4809_p1)   ;;  %v5559_v14 = vld [vmem:[%s6694_s13 + $0x6c] ss:$16 sps:$4 sm:$0xff] (!%p4809_p1)  }
  0x7b   : > { %v5561_v15 = vld [vmem:[%s6694_s13 + $0x60] ss:$16 sps:$4 sm:$0xff] (!%p4809_p1)   ;;  %v5562_v16 = vld [vmem:[%s6694_s13 + $0x68] ss:$16 sps:$4 sm:$0xff] (!%p4809_p1)   ;;  %v5563_v17 = vld [vmem:[%s6694_s13 + $0x84] ss:$16 sps:$4 sm:$0xff] (!%p4809_p1)  }
  0x7c   : > { %1955 = vmatpush1.bf16.msra.mxu0 %v5549_v7  ;;  %2127 = vmatpush1.bf16.msra.mxu1 %v5550_v8  ;;  %v5565_v18 = vld [vmem:[%s6694_s13 + $0x8c] ss:$16 sps:$4 sm:$0xff]   ;;  %v5567_v19 = vld [vmem:[%s6694_s13 + $0x80] ss:$16 sps:$4 sm:$0xff]   ;;  %v5568_v20 = vld [vmem:[%s6694_s13 + $0x88] ss:$16 sps:$4 sm:$0xff]  }
  0x7d   : > { %1956 = vmatprep.subr.bf16.mxu0 %v5551_v9  ;;  %2128 = vmatprep.subr.bf16.mxu1 %v5553_v10  ;;  %v5569_v21 = vld [vmem:[%s6694_s13 + $0xa4] ss:$16 sps:$4 sm:$0xff]   ;;  %v5571_v22 = vld [vmem:[%s6694_s13 + $0xac] ss:$16 sps:$4 sm:$0xff]   ;;  %v5573_v23 = vld [vmem:[%s6694_s13 + $0xa0] ss:$16 sps:$4 sm:$0xff]  }
  0x7e   : > { %v5574_v24 = vld [vmem:[%s6694_s13 + $0xa8] ss:$16 sps:$4 sm:$0xff]   ;;  %v5575_v25 = vld [vmem:[%s6694_s13 + $0xc4] ss:$16 sps:$4 sm:$0xff]   ;;  %v5577_v26 = vld [vmem:[%s6694_s13 + $0xcc] ss:$16 sps:$4 sm:$0xff]  }
  0x7f   : > { %v5579_v27 = vld [vmem:[%s6694_s13 + $0xc0] ss:$16 sps:$4 sm:$0xff]   ;;  %v5580_v28 = vld [vmem:[%s6694_s13 + $0xc8] ss:$16 sps:$4 sm:$0xff]   ;;  %v5581_v29 = vld [vmem:[%s6694_s13 + $0xe4] ss:$16 sps:$4 sm:$0xff]  }
  0x80   : > { %1957 = vmatpush1.bf16.msra.mxu0 %v5555_v11  ;;  %2129 = vmatpush1.bf16.msra.mxu1 %v5556_v12  ;;  %v5583_v30 = vld [vmem:[%s6694_s13 + $0xec] ss:$16 sps:$4 sm:$0xff]   ;;  %v5585_v31 = vld [vmem:[%s6694_s13 + $0xe0] ss:$16 sps:$4 sm:$0xff]   ;;  %v5586_v32 = vld [vmem:[%s6694_s13 + $0xe8] ss:$16 sps:$4 sm:$0xff]  }
  0x81   : > { %1958 = vmatprep.subr.bf16.mxu0 %v5557_v13  ;;  %2130 = vmatprep.subr.bf16.mxu1 %v5559_v14  ;;  %v5587_v33 = vld [vmem:[%s6694_s13 + $0x104] ss:$16 sps:$4 sm:$0xff]   ;;  %v5589_v34 = vld [vmem:[%s6694_s13 + $0x10c] ss:$16 sps:$4 sm:$0xff]   ;;  %v5591_v35 = vld [vmem:[%s6694_s13 + $0x100] ss:$16 sps:$4 sm:$0xff]  }
  0x82   : > { %v5592_v36 = vld [vmem:[%s6694_s13 + $0x108] ss:$16 sps:$4 sm:$0xff]   ;;  %v5593_v37 = vld [vmem:[%s6694_s13 + $0x124] ss:$16 sps:$4 sm:$0xff]   ;;  %v5595_v38 = vld [vmem:[%s6694_s13 + $0x12c] ss:$16 sps:$4 sm:$0xff]  }
  0x83   : > { %v5597_v39 = vld [vmem:[%s6694_s13 + $0x120] ss:$16 sps:$4 sm:$0xff]   ;;  %v5598_v40 = vld [vmem:[%s6694_s13 + $0x128] ss:$16 sps:$4 sm:$0xff]   ;;  %v5599_v41 = vld [vmem:[%s6694_s13 + $0x144] ss:$16 sps:$4 sm:$0xff]  }
  0x84   : > { %1959 = vmatpush1.bf16.msra.mxu0 %v5561_v15  ;;  %2131 = vmatpush1.bf16.msra.mxu1 %v5562_v16  ;;  %v5601_v42 = vld [vmem:[%s6694_s13 + $0x14c] ss:$16 sps:$4 sm:$0xff]   ;;  %v5603_v43 = vld [vmem:[%s6694_s13 + $0x140] ss:$16 sps:$4 sm:$0xff]   ;;  %v5604_v44 = vld [vmem:[%s6694_s13 + $0x148] ss:$16 sps:$4 sm:$0xff]  }
  0x85   : > { %1960 = vmatprep.subr.bf16.mxu0 %v5563_v17  ;;  %2132 = vmatprep.subr.bf16.mxu1 %v5565_v18  ;;  %v5605_v45 = vld [vmem:[%s6694_s13 + $0x164] ss:$16 sps:$4 sm:$0xff]   ;;  %v5607_v46 = vld [vmem:[%s6694_s13 + $0x16c] ss:$16 sps:$4 sm:$0xff]   ;;  %v5609_v49 = vld [vmem:[%s6694_s13 + $0x160] ss:$16 sps:$4 sm:$0xff]  }
  0x86   : > { %v372_v48 = vld [vmem:[%s7380_s0 + $0x20] sm:$0xff]  ;;  %v5610_v50 = vld [vmem:[%s6694_s13 + $0x168] ss:$16 sps:$4 sm:$0xff]   ;;  %v5613_v53 = vld [vmem:[%s6694_s13 + $0x18c] ss:$16 sps:$4 sm:$0xff]  }
  0x87   : > { %v4811_v51 = vcombine.high %v368_v47, %v372_v48  ;;  %v5611_v52 = vld [vmem:[%s6694_s13 + $0x184] ss:$16 sps:$4 sm:$0xff]   ;;  %v5615_v54 = vld [vmem:[%s6694_s13 + $0x180] ss:$16 sps:$4 sm:$0xff]   ;;  %v5616_v55 = vld [vmem:[%s6694_s13 + $0x188] ss:$16 sps:$4 sm:$0xff]   ;;  %v4810_v6 = vcombine.low %v368_v47, %v372_v48 }
  0x88   : > { %1961 = vmatpush1.bf16.msra.mxu0 %v5567_v19  ;;  %2133 = vmatpush1.bf16.msra.mxu1 %v5568_v20  ;;  %v5617_v56 = vld [vmem:[%s6694_s13 + $0x1a4] ss:$16 sps:$4 sm:$0xff]   ;;  %v5619_v57 = vld [vmem:[%s6694_s13 + $0x1ac] ss:$16 sps:$4 sm:$0xff]   ;;  %v5621_v58 = vld [vmem:[%s6694_s13 + $0x1a0] ss:$16 sps:$4 sm:$0xff]  }
  0x89   : > { %1962 = vmatprep.subr.bf16.mxu0 %v5569_v21  ;;  %2134 = vmatprep.subr.bf16.mxu1 %v5571_v22  ;;  %v5622_v59 = vld [vmem:[%s6694_s13 + $0x1a8] ss:$16 sps:$4 sm:$0xff]   ;;  %v5623_v60 = vld [vmem:[%s6694_s13 + $0x1c4] ss:$16 sps:$4 sm:$0xff]   ;;  %v5625_v61 = vld [vmem:[%s6694_s13 + $0x1cc] ss:$16 sps:$4 sm:$0xff]  }
  0x8a   : > { %1984 = vmatprep.mubr.bf16.mxu0 %v4811_v51  ;;  %2156 = vmatprep.mubr.bf16.mxu1 %v4811_v51  ;;  %v5627_v62 = vld [vmem:[%s6694_s13 + $0x1c0] ss:$16 sps:$4 sm:$0xff]   ;;  %v5628_v63 = vld [vmem:[%s6694_s13 + $0x1c8] ss:$16 sps:$4 sm:$0xff]   ;;  %v5629_v0 = vld [vmem:[%s6694_s13 + $0x1e4] ss:$16 sps:$4 sm:$0xff]  }
  0x8b   : > { %v5631_v1 = vld [vmem:[%s6694_s13 + $0x1ec] ss:$16 sps:$4 sm:$0xff]   ;;  %v5633_v2 = vld [vmem:[%s6694_s13 + $0x1e0] ss:$16 sps:$4 sm:$0xff]   ;;  %v5634_v3 = vld [vmem:[%s6694_s13 + $0x1e8] ss:$16 sps:$4 sm:$0xff]  }
  0x8c   : > { %1963 = vmatpush1.bf16.msra.mxu0 %v5573_v23  ;;  %2135 = vmatpush1.bf16.msra.mxu1 %v5574_v24  ;;  %v5637_v4 = vld [vmem:[%s6694_s13 + $0x204] ss:$16 sps:$4 sm:$0xff]   ;;  %v5640_v5 = vld [vmem:[%s6694_s13 + $0x20c] ss:$16 sps:$4 sm:$0xff]   ;;  %v5635_v7 = vld [vmem:[%s6694_s13 + $0x200] ss:$16 sps:$4 sm:$0xff]  }
  0x8d   : > { %1964 = vmatprep.subr.bf16.mxu0 %v5575_v25  ;;  %2136 = vmatprep.subr.bf16.mxu1 %v5577_v26  ;;  %v5638_v8 = vld [vmem:[%s6694_s13 + $0x208] ss:$16 sps:$4 sm:$0xff]   ;;  %v5643_v9 = vld [vmem:[%s6694_s13 + $0x224] ss:$16 sps:$4 sm:$0xff]   ;;  %v5646_v10 = vld [vmem:[%s6694_s13 + $0x22c] ss:$16 sps:$4 sm:$0xff]  }
  0x8e   : > { %v5641_v11 = vld [vmem:[%s6694_s13 + $0x220] ss:$16 sps:$4 sm:$0xff]   ;;  %v5644_v12 = vld [vmem:[%s6694_s13 + $0x228] ss:$16 sps:$4 sm:$0xff]   ;;  %v5649_v13 = vld [vmem:[%s6694_s13 + $0x244] ss:$16 sps:$4 sm:$0xff]  }
  0x8f   : > { %v5652_v14 = vld [vmem:[%s6694_s13 + $0x24c] ss:$16 sps:$4 sm:$0xff]   ;;  %v5647_v15 = vld [vmem:[%s6694_s13 + $0x240] ss:$16 sps:$4 sm:$0xff]   ;;  %v5650_v16 = vld [vmem:[%s6694_s13 + $0x248] ss:$16 sps:$4 sm:$0xff]  }
  0x90   : > { %1965 = vmatpush1.bf16.msra.mxu0 %v5579_v27  ;;  %2137 = vmatpush1.bf16.msra.mxu1 %v5580_v28  ;;  %v5655_v17 = vld [vmem:[%s6694_s13 + $0x264] ss:$16 sps:$4 sm:$0xff]   ;;  %v5658_v18 = vld [vmem:[%s6694_s13 + $0x26c] ss:$16 sps:$4 sm:$0xff]   ;;  %v5653_v19 = vld [vmem:[%s6694_s13 + $0x260] ss:$16 sps:$4 sm:$0xff]  }
  0x91   : > { %1966 = vmatprep.subr.bf16.mxu0 %v5581_v29  ;;  %2138 = vmatprep.subr.bf16.mxu1 %v5583_v30  ;;  %v5656_v20 = vld [vmem:[%s6694_s13 + $0x268] ss:$16 sps:$4 sm:$0xff]   ;;  %v5661_v21 = vld [vmem:[%s6694_s13 + $0x284] ss:$16 sps:$4 sm:$0xff]   ;;  %v5664_v22 = vld [vmem:[%s6694_s13 + $0x28c] ss:$16 sps:$4 sm:$0xff]  }
  0x92   : > { %v5659_v23 = vld [vmem:[%s6694_s13 + $0x280] ss:$16 sps:$4 sm:$0xff]   ;;  %v5662_v24 = vld [vmem:[%s6694_s13 + $0x288] ss:$16 sps:$4 sm:$0xff]   ;;  %v5667_v25 = vld [vmem:[%s6694_s13 + $0x2a4] ss:$16 sps:$4 sm:$0xff]  }
  0x93   : > { %v5670_v26 = vld [vmem:[%s6694_s13 + $0x2ac] ss:$16 sps:$4 sm:$0xff]   ;;  %v5665_v27 = vld [vmem:[%s6694_s13 + $0x2a0] ss:$16 sps:$4 sm:$0xff]   ;;  %v5668_v28 = vld [vmem:[%s6694_s13 + $0x2a8] ss:$16 sps:$4 sm:$0xff]  }
  0x94   : > { %1967 = vmatpush1.bf16.msra.mxu0 %v5585_v31  ;;  %2139 = vmatpush1.bf16.msra.mxu1 %v5586_v32  ;;  %v5673_v29 = vld [vmem:[%s6694_s13 + $0x2c4] ss:$16 sps:$4 sm:$0xff]   ;;  %v5676_v30 = vld [vmem:[%s6694_s13 + $0x2cc] ss:$16 sps:$4 sm:$0xff]   ;;  %v5692_v47 = vld [vmem:[%s6694_s13 + $0x328] ss:$16 sps:$4 sm:$0xff]  }
  0x95   : > { %1968 = vmatprep.subr.bf16.mxu0 %v5587_v33  ;;  %2140 = vmatprep.subr.bf16.mxu1 %v5589_v34  ;;  %v6817_v31 = vld [vmem:[%s7380_s0 + $0x8] sm:$0xff]  ;;  %v5671_v33 = vld [vmem:[%s6694_s13 + $0x2c0] ss:$16 sps:$4 sm:$0xff]   ;;  %v5697_v48 = vld [vmem:[%s6694_s13 + $0x344] ss:$16 sps:$4 sm:$0xff]  }
  0x96   : > { %v6822_v32 = vld [vmem:[%s7380_s0 + $0x28] sm:$0xff] }
  0x97   : > { %v5674_v34 = vld [vmem:[%s6694_s13 + $0x2c8] ss:$16 sps:$4 sm:$0xff]  }
  0x98   : > { %1969 = vmatpush1.bf16.msra.mxu0 %v5591_v35  ;;  %2141 = vmatpush1.bf16.msra.mxu1 %v5592_v36  ;;  %v4813_v35 = vcombine.high %v6817_v31, %v6822_v32  ;;  %v5679_v36 = vld [vmem:[%s6694_s13 + $0x2e4] ss:$16 sps:$4 sm:$0xff]   ;;  %v5698_v51 = vld [vmem:[%s6694_s13 + $0x348] ss:$16 sps:$4 sm:$0xff]  }
  0x99   : > { %1970 = vmatprep.subr.bf16.mxu0 %v5593_v37  ;;  %2142 = vmatprep.subr.bf16.mxu1 %v5595_v38  ;;  %v5682_v37 = vld [vmem:[%s6694_s13 + $0x2ec] ss:$16 sps:$4 sm:$0xff]   ;;  %v5677_v38 = vld [vmem:[%s6694_s13 + $0x2e0] ss:$16 sps:$4 sm:$0xff]  }
  0x9c   : > { %1971 = vmatpush1.bf16.msra.mxu0 %v5597_v39  ;;  %2143 = vmatpush1.bf16.msra.mxu1 %v5598_v40  ;;  %v5680_v39 = vld [vmem:[%s6694_s13 + $0x2e8] ss:$16 sps:$4 sm:$0xff]   ;;  %v5685_v40 = vld [vmem:[%s6694_s13 + $0x304] ss:$16 sps:$4 sm:$0xff]  }
  0x9d   : > { %1972 = vmatprep.subr.bf16.mxu0 %v5599_v41  ;;  %2144 = vmatprep.subr.bf16.mxu1 %v5601_v42  ;;  %v5688_v41 = vld [vmem:[%s6694_s13 + $0x30c] ss:$16 sps:$4 sm:$0xff]   ;;  %v5683_v42 = vld [vmem:[%s6694_s13 + $0x300] ss:$16 sps:$4 sm:$0xff]  }
  0xa0   : > { %1973 = vmatpush1.bf16.msra.mxu0 %v5603_v43  ;;  %2145 = vmatpush1.bf16.msra.mxu1 %v5604_v44  ;;  %v5686_v43 = vld [vmem:[%s6694_s13 + $0x308] ss:$16 sps:$4 sm:$0xff]   ;;  %v5691_v44 = vld [vmem:[%s6694_s13 + $0x324] ss:$16 sps:$4 sm:$0xff]  }
  0xa1   : > { %1974 = vmatprep.subr.bf16.mxu0 %v5605_v45  ;;  %2146 = vmatprep.subr.bf16.mxu1 %v5607_v46  ;;  %v5694_v45 = vld [vmem:[%s6694_s13 + $0x32c] ss:$16 sps:$4 sm:$0xff]   ;;  %v5689_v46 = vld [vmem:[%s6694_s13 + $0x320] ss:$16 sps:$4 sm:$0xff]  }
  0xa4   : > { %1975 = vmatpush1.bf16.msra.mxu0 %v5609_v49  ;;  %2147 = vmatpush1.bf16.msra.mxu1 %v5610_v50  ;;  %v5700_v49 = vld [vmem:[%s6694_s13 + $0x34c] ss:$16 sps:$4 sm:$0xff]   ;;  %v5695_v50 = vld [vmem:[%s6694_s13 + $0x340] ss:$16 sps:$4 sm:$0xff]  }
  0xa5   : > { %1976 = vmatprep.subr.bf16.mxu0 %v5611_v52  ;;  %2148 = vmatprep.subr.bf16.mxu1 %v5613_v53  ;;  %v5703_v52 = vld [vmem:[%s6694_s13 + $0x364] ss:$16 sps:$4 sm:$0xff]   ;;  %v5706_v53 = vld [vmem:[%s6694_s13 + $0x36c] ss:$16 sps:$4 sm:$0xff]  }
  0xa8   : > { %1977 = vmatpush1.bf16.msra.mxu0 %v5615_v54  ;;  %2149 = vmatpush1.bf16.msra.mxu1 %v5616_v55  ;;  %v5701_v54 = vld [vmem:[%s6694_s13 + $0x360] ss:$16 sps:$4 sm:$0xff]   ;;  %v5704_v55 = vld [vmem:[%s6694_s13 + $0x368] ss:$16 sps:$4 sm:$0xff]  }
  0xa9   : > { %1978 = vmatprep.subr.bf16.mxu0 %v5617_v56  ;;  %2150 = vmatprep.subr.bf16.mxu1 %v5619_v57  ;;  %v5709_v56 = vld [vmem:[%s6694_s13 + $0x384] ss:$16 sps:$4 sm:$0xff]   ;;  %v5712_v57 = vld [vmem:[%s6694_s13 + $0x38c] ss:$16 sps:$4 sm:$0xff]  }
  0xac   : > { %1979 = vmatpush1.bf16.msra.mxu0 %v5621_v58  ;;  %2151 = vmatpush1.bf16.msra.mxu1 %v5622_v59  ;;  %v5707_v58 = vld [vmem:[%s6694_s13 + $0x380] ss:$16 sps:$4 sm:$0xff]   ;;  %v5710_v59 = vld [vmem:[%s6694_s13 + $0x388] ss:$16 sps:$4 sm:$0xff]  }
  0xad   : > { %1980 = vmatprep.subr.bf16.mxu0 %v5623_v60  ;;  %2152 = vmatprep.subr.bf16.mxu1 %v5625_v61  ;;  %v5715_v60 = vld [vmem:[%s6694_s13 + $0x3a4] ss:$16 sps:$4 sm:$0xff]   ;;  %v5718_v61 = vld [vmem:[%s6694_s13 + $0x3ac] ss:$16 sps:$4 sm:$0xff]  }
  0xb0   : > { %1981 = vmatpush1.bf16.msra.mxu0 %v5627_v62  ;;  %2153 = vmatpush1.bf16.msra.mxu1 %v5628_v63  ;;  %v5713_v62 = vld [vmem:[%s6694_s13 + $0x3a0] ss:$16 sps:$4 sm:$0xff]   ;;  %v5716_v63 = vld [vmem:[%s6694_s13 + $0x3a8] ss:$16 sps:$4 sm:$0xff]  }
  0xb1   : > { %1982 = vmatprep.subr.bf16.mxu0 %v5629_v0  ;;  %2154 = vmatprep.subr.bf16.mxu1 %v5631_v1  ;;  %v5721_v0 = vld [vmem:[%s6694_s13 + $0x3c4] ss:$16 sps:$4 sm:$0xff]   ;;  %v5724_v1 = vld [vmem:[%s6694_s13 + $0x3cc] ss:$16 sps:$4 sm:$0xff]  }
  0xb4   : > { %1983 = vmatpush1.bf16.msra.mxu0 %v5633_v2  ;;  %2155 = vmatpush1.bf16.msra.mxu1 %v5634_v3  ;;  %v5719_v2 = vld [vmem:[%s6694_s13 + $0x3c0] ss:$16 sps:$4 sm:$0xff]   ;;  %v5722_v3 = vld [vmem:[%s6694_s13 + $0x3c8] ss:$16 sps:$4 sm:$0xff]  }
  0xb5   : > { %1995 = vmatprep.subr.bf16.mxu0 %v5637_v4  ;;  %2167 = vmatprep.subr.bf16.mxu1 %v5640_v5  ;;  %v5727_v4 = vld [vmem:[%s6694_s13 + $0x3e4] ss:$16 sps:$4 sm:$0xff]   ;;  %v5730_v5 = vld [vmem:[%s6694_s13 + $0x3ec] ss:$16 sps:$4 sm:$0xff]  }
  0xb7   : > { %1985 = vmatmul.mubr.bf16.vlgmr.msra.gmra.mrb[0].mxu0 %v4810_v6  ;;  %2157 = vmatmul.mubr.bf16.vlgmr.msra.gmra.mrb[0].mxu1 %v4810_v6  ;;  %v5725_v6 = vld [vmem:[%s6694_s13 + $0x3e0] ss:$16 sps:$4 sm:$0xff]  }
  0xb8   : > { %1996 = vmatpush1.bf16.msra.mxu0 %v5635_v7  ;;  %2168 = vmatpush1.bf16.msra.mxu1 %v5638_v8  ;;  %v5728_v7 = vld [vmem:[%s6694_s13 + $0x3e8] ss:$16 sps:$4 sm:$0xff]   ;;  %v5733_v8 = vld [vmem:[%s6694_s13 + $0x404] ss:$16 sps:$4 sm:$0xff]  }
  0xb9   : > { %1997 = vmatprep.subr.bf16.mxu0 %v5643_v9  ;;  %2169 = vmatprep.subr.bf16.mxu1 %v5646_v10  ;;  %v5736_v9 = vld [vmem:[%s6694_s13 + $0x40c] ss:$16 sps:$4 sm:$0xff]   ;;  %v4812_v10 = vcombine.low %v6817_v31, %v6822_v32  ;;  %v5758_v31 = vld [vmem:[%s6694_s13 + $0x488] ss:$16 sps:$4 sm:$0xff]   ;;  %v5763_v32 = vld [vmem:[%s6694_s13 + $0x4a4] ss:$16 sps:$4 sm:$0xff]  }
  0xba   : > { %2027 = vmatprep.mubr.bf16.mxu0 %v4813_v35  ;;  %2199 = vmatprep.mubr.bf16.mxu1 %v4813_v35  ;;  %v5764_v35 = vld [vmem:[%s6694_s13 + $0x4a8] ss:$16 sps:$4 sm:$0xff]  }
  0xbc   : > { %1998 = vmatpush1.bf16.msra.mxu0 %v5641_v11  ;;  %2170 = vmatpush1.bf16.msra.mxu1 %v5644_v12  ;;  %v5731_v11 = vld [vmem:[%s6694_s13 + $0x400] ss:$16 sps:$4 sm:$0xff]   ;;  %v5734_v12 = vld [vmem:[%s6694_s13 + $0x408] ss:$16 sps:$4 sm:$0xff]  }
  0xbd   : > { %1999 = vmatprep.subr.bf16.mxu0 %v5649_v13  ;;  %2171 = vmatprep.subr.bf16.mxu1 %v5652_v14  ;;  %v5739_v13 = vld [vmem:[%s6694_s13 + $0x424] ss:$16 sps:$4 sm:$0xff]   ;;  %v5742_v14 = vld [vmem:[%s6694_s13 + $0x42c] ss:$16 sps:$4 sm:$0xff]  }
  0xc0   : > { %2000 = vmatpush1.bf16.msra.mxu0 %v5647_v15  ;;  %2172 = vmatpush1.bf16.msra.mxu1 %v5650_v16  ;;  %v6875_v15 = vld [vmem:[%s7380_s0 + $0x10] sm:$0xff] }
  0xc1   : > { %2001 = vmatprep.subr.bf16.mxu0 %v5655_v17  ;;  %2173 = vmatprep.subr.bf16.mxu1 %v5658_v18  ;;  %v6880_v16 = vld [vmem:[%s7380_s0 + $0x30] sm:$0xff] }
  0xc2   : > { %v4815_v17 = vcombine.high %v6875_v15, %v6880_v16  ;;  %v5737_v18 = vld [vmem:[%s6694_s13 + $0x420] ss:$16 sps:$4 sm:$0xff]  }
  0xc4   : > { %2002 = vmatpush1.bf16.msra.mxu0 %v5653_v19  ;;  %2174 = vmatpush1.bf16.msra.mxu1 %v5656_v20  ;;  %v5740_v19 = vld [vmem:[%s6694_s13 + $0x428] ss:$16 sps:$4 sm:$0xff]   ;;  %v5745_v20 = vld [vmem:[%s6694_s13 + $0x444] ss:$16 sps:$4 sm:$0xff]  }
  0xc5   : > { %2003 = vmatprep.subr.bf16.mxu0 %v5661_v21  ;;  %2175 = vmatprep.subr.bf16.mxu1 %v5664_v22  ;;  %v5748_v21 = vld [vmem:[%s6694_s13 + $0x44c] ss:$16 sps:$4 sm:$0xff]   ;;  %v5743_v22 = vld [vmem:[%s6694_s13 + $0x440] ss:$16 sps:$4 sm:$0xff]  }
  0xc8   : > { %2004 = vmatpush1.bf16.msra.mxu0 %v5659_v23  ;;  %2176 = vmatpush1.bf16.msra.mxu1 %v5662_v24  ;;  %v5746_v23 = vld [vmem:[%s6694_s13 + $0x448] ss:$16 sps:$4 sm:$0xff]   ;;  %v5751_v24 = vld [vmem:[%s6694_s13 + $0x464] ss:$16 sps:$4 sm:$0xff]  }
  0xc9   : > { %2005 = vmatprep.subr.bf16.mxu0 %v5667_v25  ;;  %2177 = vmatprep.subr.bf16.mxu1 %v5670_v26  ;;  %v5754_v25 = vld [vmem:[%s6694_s13 + $0x46c] ss:$16 sps:$4 sm:$0xff]   ;;  %v5749_v26 = vld [vmem:[%s6694_s13 + $0x460] ss:$16 sps:$4 sm:$0xff]  }
  0xcc   : > { %2006 = vmatpush1.bf16.msra.mxu0 %v5665_v27  ;;  %2178 = vmatpush1.bf16.msra.mxu1 %v5668_v28  ;;  %v5752_v27 = vld [vmem:[%s6694_s13 + $0x468] ss:$16 sps:$4 sm:$0xff]   ;;  %v5757_v28 = vld [vmem:[%s6694_s13 + $0x484] ss:$16 sps:$4 sm:$0xff]  }
  0xcd   : > { %2007 = vmatprep.subr.bf16.mxu0 %v5673_v29  ;;  %2179 = vmatprep.subr.bf16.mxu1 %v5676_v30  ;;  %v5760_v29 = vld [vmem:[%s6694_s13 + $0x48c] ss:$16 sps:$4 sm:$0xff]   ;;  %v5755_v30 = vld [vmem:[%s6694_s13 + $0x480] ss:$16 sps:$4 sm:$0xff]  }
  0xd0   : > { %2008 = vmatpush1.bf16.msra.mxu0 %v5671_v33  ;;  %2180 = vmatpush1.bf16.msra.mxu1 %v5674_v34  ;;  %v5766_v33 = vld [vmem:[%s6694_s13 + $0x4ac] ss:$16 sps:$4 sm:$0xff]   ;;  %v5761_v34 = vld [vmem:[%s6694_s13 + $0x4a0] ss:$16 sps:$4 sm:$0xff]  }
  0xd1   : > { %2009 = vmatprep.subr.bf16.mxu0 %v5679_v36  ;;  %2181 = vmatprep.subr.bf16.mxu1 %v5682_v37  ;;  %v5769_v36 = vld [vmem:[%s6694_s13 + $0x4c4] ss:$16 sps:$4 sm:$0xff]   ;;  %v5772_v37 = vld [vmem:[%s6694_s13 + $0x4cc] ss:$16 sps:$4 sm:$0xff]  }
  0xd4   : > { %2010 = vmatpush1.bf16.msra.mxu0 %v5677_v38  ;;  %2182 = vmatpush1.bf16.msra.mxu1 %v5680_v39  ;;  %v5767_v38 = vld [vmem:[%s6694_s13 + $0x4c0] ss:$16 sps:$4 sm:$0xff]   ;;  %v5770_v39 = vld [vmem:[%s6694_s13 + $0x4c8] ss:$16 sps:$4 sm:$0xff]  }
  0xd5   : > { %2011 = vmatprep.subr.bf16.mxu0 %v5685_v40  ;;  %2183 = vmatprep.subr.bf16.mxu1 %v5688_v41  ;;  %v5775_v40 = vld [vmem:[%s6694_s13 + $0x4e4] ss:$16 sps:$4 sm:$0xff]   ;;  %v5778_v41 = vld [vmem:[%s6694_s13 + $0x4ec] ss:$16 sps:$4 sm:$0xff]  }
  0xd8   : > { %2012 = vmatpush1.bf16.msra.mxu0 %v5683_v42  ;;  %2184 = vmatpush1.bf16.msra.mxu1 %v5686_v43  ;;  %v5773_v42 = vld [vmem:[%s6694_s13 + $0x4e0] ss:$16 sps:$4 sm:$0xff]   ;;  %v5776_v43 = vld [vmem:[%s6694_s13 + $0x4e8] ss:$16 sps:$4 sm:$0xff]  }
  0xd9   : > { %2013 = vmatprep.subr.bf16.mxu0 %v5691_v44  ;;  %2185 = vmatprep.subr.bf16.mxu1 %v5694_v45  ;;  %v5781_v44 = vld [vmem:[%s6694_s13 + $0x504] ss:$16 sps:$4 sm:$0xff]   ;;  %v5784_v45 = vld [vmem:[%s6694_s13 + $0x50c] ss:$16 sps:$4 sm:$0xff]  }
  0xdc   : > { %2014 = vmatpush1.bf16.msra.mxu0 %v5689_v46  ;;  %2186 = vmatpush1.bf16.msra.mxu1 %v5692_v47  ;;  %v5779_v46 = vld [vmem:[%s6694_s13 + $0x500] ss:$16 sps:$4 sm:$0xff]   ;;  %v5782_v47 = vld [vmem:[%s6694_s13 + $0x508] ss:$16 sps:$4 sm:$0xff]  }
  0xdd   : > { %2015 = vmatprep.subr.bf16.mxu0 %v5697_v48  ;;  %2187 = vmatprep.subr.bf16.mxu1 %v5700_v49  ;;  %v5787_v48 = vld [vmem:[%s6694_s13 + $0x524] ss:$16 sps:$4 sm:$0xff]   ;;  %v5790_v49 = vld [vmem:[%s6694_s13 + $0x52c] ss:$16 sps:$4 sm:$0xff]  }
  0xe0   : > { %2016 = vmatpush1.bf16.msra.mxu0 %v5695_v50  ;;  %2188 = vmatpush1.bf16.msra.mxu1 %v5698_v51  ;;  %v5785_v50 = vld [vmem:[%s6694_s13 + $0x520] ss:$16 sps:$4 sm:$0xff]   ;;  %v5788_v51 = vld [vmem:[%s6694_s13 + $0x528] ss:$16 sps:$4 sm:$0xff]  }
  0xe1   : > { %2017 = vmatprep.subr.bf16.mxu0 %v5703_v52  ;;  %2189 = vmatprep.subr.bf16.mxu1 %v5706_v53  ;;  %v5793_v52 = vld [vmem:[%s6694_s13 + $0x544] ss:$16 sps:$4 sm:$0xff]   ;;  %v5796_v53 = vld [vmem:[%s6694_s13 + $0x54c] ss:$16 sps:$4 sm:$0xff]  }
  0xe4   : > { %2018 = vmatpush1.bf16.msra.mxu0 %v5701_v54  ;;  %2190 = vmatpush1.bf16.msra.mxu1 %v5704_v55  ;;  %v5791_v54 = vld [vmem:[%s6694_s13 + $0x540] ss:$16 sps:$4 sm:$0xff]   ;;  %v5794_v55 = vld [vmem:[%s6694_s13 + $0x548] ss:$16 sps:$4 sm:$0xff]  }
  0xe5   : > { %2019 = vmatprep.subr.bf16.mxu0 %v5709_v56  ;;  %2191 = vmatprep.subr.bf16.mxu1 %v5712_v57  ;;  %v5799_v56 = vld [vmem:[%s6694_s13 + $0x564] ss:$16 sps:$4 sm:$0xff]   ;;  %v5802_v57 = vld [vmem:[%s6694_s13 + $0x56c] ss:$16 sps:$4 sm:$0xff]  }
  0xe8   : > { %2020 = vmatpush1.bf16.msra.mxu0 %v5707_v58  ;;  %2192 = vmatpush1.bf16.msra.mxu1 %v5710_v59  ;;  %v5797_v58 = vld [vmem:[%s6694_s13 + $0x560] ss:$16 sps:$4 sm:$0xff]   ;;  %v5800_v59 = vld [vmem:[%s6694_s13 + $0x568] ss:$16 sps:$4 sm:$0xff]  }
  0xe9   : > { %2021 = vmatprep.subr.bf16.mxu0 %v5715_v60  ;;  %2193 = vmatprep.subr.bf16.mxu1 %v5718_v61  ;;  %v5805_v60 = vld [vmem:[%s6694_s13 + $0x584] ss:$16 sps:$4 sm:$0xff]   ;;  %v5808_v61 = vld [vmem:[%s6694_s13 + $0x58c] ss:$16 sps:$4 sm:$0xff]  }
  0xec   : > { %2022 = vmatpush1.bf16.msra.mxu0 %v5713_v62  ;;  %2194 = vmatpush1.bf16.msra.mxu1 %v5716_v63  ;;  %v5803_v62 = vld [vmem:[%s6694_s13 + $0x580] ss:$16 sps:$4 sm:$0xff]   ;;  %v5806_v63 = vld [vmem:[%s6694_s13 + $0x588] ss:$16 sps:$4 sm:$0xff]  }
  0xed   : > { %2023 = vmatprep.subr.bf16.mxu0 %v5721_v0  ;;  %2195 = vmatprep.subr.bf16.mxu1 %v5724_v1  ;;  %v5811_v0 = vld [vmem:[%s6694_s13 + $0x5a4] ss:$16 sps:$4 sm:$0xff]   ;;  %v5814_v1 = vld [vmem:[%s6694_s13 + $0x5ac] ss:$16 sps:$4 sm:$0xff]  }
  0xf0   : > { %2024 = vmatpush1.bf16.msra.mxu0 %v5719_v2  ;;  %2196 = vmatpush1.bf16.msra.mxu1 %v5722_v3  ;;  %v5809_v2 = vld [vmem:[%s6694_s13 + $0x5a0] ss:$16 sps:$4 sm:$0xff]   ;;  %v5812_v3 = vld [vmem:[%s6694_s13 + $0x5a8] ss:$16 sps:$4 sm:$0xff]  }
  0xf1   : > { %2025 = vmatprep.subr.bf16.mxu0 %v5727_v4  ;;  %2197 = vmatprep.subr.bf16.mxu1 %v5730_v5  ;;  %v5817_v4 = vld [vmem:[%s6694_s13 + $0x5c4] ss:$16 sps:$4 sm:$0xff]   ;;  %v5820_v5 = vld [vmem:[%s6694_s13 + $0x5cc] ss:$16 sps:$4 sm:$0xff]  }
  0xf4   : > { %2026 = vmatpush1.bf16.msra.mxu0 %v5725_v6  ;;  %2198 = vmatpush1.bf16.msra.mxu1 %v5728_v7  ;;  %v5815_v6 = vld [vmem:[%s6694_s13 + $0x5c0] ss:$16 sps:$4 sm:$0xff]   ;;  %v5818_v7 = vld [vmem:[%s6694_s13 + $0x5c8] ss:$16 sps:$4 sm:$0xff]  }
  0xf5   : > { %2038 = vmatprep.subr.bf16.mxu0 %v5733_v8  ;;  %2210 = vmatprep.subr.bf16.mxu1 %v5736_v9  ;;  %v5823_v8 = vld [vmem:[%s6694_s13 + $0x5e4] ss:$16 sps:$4 sm:$0xff]   ;;  %v5826_v9 = vld [vmem:[%s6694_s13 + $0x5ec] ss:$16 sps:$4 sm:$0xff]  }
  0xf7   : > { %2028 = vmatmul.mubr.bf16.vlgmr.msra.gmra.mrb[0].mxu0 %v4812_v10  ;;  %2200 = vmatmul.mubr.bf16.vlgmr.msra.gmra.mrb[0].mxu1 %v4812_v10  ;;  %v5821_v10 = vld [vmem:[%s6694_s13 + $0x5e0] ss:$16 sps:$4 sm:$0xff]  }
  0xf8   : > { %2039 = vmatpush1.bf16.msra.mxu0 %v5731_v11  ;;  %2211 = vmatpush1.bf16.msra.mxu1 %v5734_v12  ;;  %v5824_v11 = vld [vmem:[%s6694_s13 + $0x5e8] ss:$16 sps:$4 sm:$0xff]   ;;  %v5829_v12 = vld [vmem:[%s6694_s13 + $0x604] ss:$16 sps:$4 sm:$0xff]  }
  0xf9   : > { %2040 = vmatprep.subr.bf16.mxu0 %v5739_v13  ;;  %2212 = vmatprep.subr.bf16.mxu1 %v5742_v14  ;;  %v5832_v13 = vld [vmem:[%s6694_s13 + $0x60c] ss:$16 sps:$4 sm:$0xff]   ;;  %v4814_v14 = vcombine.low %v6875_v15, %v6880_v16  ;;  %v5835_v15 = vld [vmem:[%s6694_s13 + $0x624] ss:$16 sps:$4 sm:$0xff]  }
  0xfa   : > { %2070 = vmatprep.mubr.bf16.mxu0 %v4815_v17  ;;  %2242 = vmatprep.mubr.bf16.mxu1 %v4815_v17  ;;  %v6949_v17 = vld [vmem:[%s7380_s0 + $0x18] sm:$0xff] }
  0xfb   : > { %v5838_v16 = vld [vmem:[%s6694_s13 + $0x62c] ss:$16 sps:$4 sm:$0xff]  }
  0xfc   : > { %2041 = vmatpush1.bf16.msra.mxu0 %v5737_v18  ;;  %2213 = vmatpush1.bf16.msra.mxu1 %v5740_v19  ;;  %v6954_v18 = vld [vmem:[%s7380_s0 + $0x38] sm:$0xff]  ;;  %v5827_v19 = vld [vmem:[%s6694_s13 + $0x600] ss:$16 sps:$4 sm:$0xff]  }
  0xfd   : > { %2042 = vmatprep.subr.bf16.mxu0 %v5745_v20  ;;  %2214 = vmatprep.subr.bf16.mxu1 %v5748_v21  ;;  %v5830_v20 = vld [vmem:[%s6694_s13 + $0x608] ss:$16 sps:$4 sm:$0xff]   ;;  %v4817_v21 = vcombine.high %v6949_v17, %v6954_v18 }
 0x100   : > { %2043 = vmatpush1.bf16.msra.mxu0 %v5743_v22  ;;  %2215 = vmatpush1.bf16.msra.mxu1 %v5746_v23  ;;  %v5833_v22 = vld [vmem:[%s6694_s13 + $0x620] ss:$16 sps:$4 sm:$0xff]   ;;  %v5836_v23 = vld [vmem:[%s6694_s13 + $0x628] ss:$16 sps:$4 sm:$0xff]  }
 0x101   : > { %2044 = vmatprep.subr.bf16.mxu0 %v5751_v24  ;;  %2216 = vmatprep.subr.bf16.mxu1 %v5754_v25  ;;  %v5841_v24 = vld [vmem:[%s6694_s13 + $0x644] ss:$16 sps:$4 sm:$0xff]   ;;  %v5844_v25 = vld [vmem:[%s6694_s13 + $0x64c] ss:$16 sps:$4 sm:$0xff]  }
 0x104   : > { %2045 = vmatpush1.bf16.msra.mxu0 %v5749_v26  ;;  %2217 = vmatpush1.bf16.msra.mxu1 %v5752_v27  ;;  %v5839_v26 = vld [vmem:[%s6694_s13 + $0x640] ss:$16 sps:$4 sm:$0xff]   ;;  %v5842_v27 = vld [vmem:[%s6694_s13 + $0x648] ss:$16 sps:$4 sm:$0xff]  }
 0x105   : > { %2046 = vmatprep.subr.bf16.mxu0 %v5757_v28  ;;  %2218 = vmatprep.subr.bf16.mxu1 %v5760_v29  ;;  %v5847_v28 = vld [vmem:[%s6694_s13 + $0x664] ss:$16 sps:$4 sm:$0xff]   ;;  %v5850_v29 = vld [vmem:[%s6694_s13 + $0x66c] ss:$16 sps:$4 sm:$0xff]  }
 0x108   : > { %2047 = vmatpush1.bf16.msra.mxu0 %v5755_v30  ;;  %2219 = vmatpush1.bf16.msra.mxu1 %v5758_v31  ;;  %v5845_v30 = vld [vmem:[%s6694_s13 + $0x660] ss:$16 sps:$4 sm:$0xff]   ;;  %v5848_v31 = vld [vmem:[%s6694_s13 + $0x668] ss:$16 sps:$4 sm:$0xff]  }
 0x109   : > { %2048 = vmatprep.subr.bf16.mxu0 %v5763_v32  ;;  %2220 = vmatprep.subr.bf16.mxu1 %v5766_v33  ;;  %v5853_v32 = vld [vmem:[%s6694_s13 + $0x684] ss:$16 sps:$4 sm:$0xff]   ;;  %v5856_v33 = vld [vmem:[%s6694_s13 + $0x68c] ss:$16 sps:$4 sm:$0xff]  }
 0x10c   : > { %2049 = vmatpush1.bf16.msra.mxu0 %v5761_v34  ;;  %2221 = vmatpush1.bf16.msra.mxu1 %v5764_v35  ;;  %v5851_v34 = vld [vmem:[%s6694_s13 + $0x680] ss:$16 sps:$4 sm:$0xff]   ;;  %v5854_v35 = vld [vmem:[%s6694_s13 + $0x688] ss:$16 sps:$4 sm:$0xff]  }
 0x10d   : > { %2050 = vmatprep.subr.bf16.mxu0 %v5769_v36  ;;  %2222 = vmatprep.subr.bf16.mxu1 %v5772_v37  ;;  %v5859_v36 = vld [vmem:[%s6694_s13 + $0x6a4] ss:$16 sps:$4 sm:$0xff]   ;;  %v5862_v37 = vld [vmem:[%s6694_s13 + $0x6ac] ss:$16 sps:$4 sm:$0xff]  }
 0x110   : > { %2051 = vmatpush1.bf16.msra.mxu0 %v5767_v38  ;;  %2223 = vmatpush1.bf16.msra.mxu1 %v5770_v39  ;;  %v5857_v38 = vld [vmem:[%s6694_s13 + $0x6a0] ss:$16 sps:$4 sm:$0xff]   ;;  %v5860_v39 = vld [vmem:[%s6694_s13 + $0x6a8] ss:$16 sps:$4 sm:$0xff]  }
 0x111   : > { %2052 = vmatprep.subr.bf16.mxu0 %v5775_v40  ;;  %2224 = vmatprep.subr.bf16.mxu1 %v5778_v41  ;;  %v5865_v40 = vld [vmem:[%s6694_s13 + $0x6c4] ss:$16 sps:$4 sm:$0xff]   ;;  %v5868_v41 = vld [vmem:[%s6694_s13 + $0x6cc] ss:$16 sps:$4 sm:$0xff]  }
 0x114   : > { %2053 = vmatpush1.bf16.msra.mxu0 %v5773_v42  ;;  %2225 = vmatpush1.bf16.msra.mxu1 %v5776_v43  ;;  %v5863_v42 = vld [vmem:[%s6694_s13 + $0x6c0] ss:$16 sps:$4 sm:$0xff]   ;;  %v5866_v43 = vld [vmem:[%s6694_s13 + $0x6c8] ss:$16 sps:$4 sm:$0xff]  }
 0x115   : > { %2054 = vmatprep.subr.bf16.mxu0 %v5781_v44  ;;  %2226 = vmatprep.subr.bf16.mxu1 %v5784_v45  ;;  %v5871_v44 = vld [vmem:[%s6694_s13 + $0x6e4] ss:$16 sps:$4 sm:$0xff]   ;;  %v5874_v45 = vld [vmem:[%s6694_s13 + $0x6ec] ss:$16 sps:$4 sm:$0xff]  }
 0x118   : > { %2055 = vmatpush1.bf16.msra.mxu0 %v5779_v46  ;;  %2227 = vmatpush1.bf16.msra.mxu1 %v5782_v47  ;;  %v5869_v46 = vld [vmem:[%s6694_s13 + $0x6e0] ss:$16 sps:$4 sm:$0xff]   ;;  %v5872_v47 = vld [vmem:[%s6694_s13 + $0x6e8] ss:$16 sps:$4 sm:$0xff]  }
 0x119   : > { %2056 = vmatprep.subr.bf16.mxu0 %v5787_v48  ;;  %2228 = vmatprep.subr.bf16.mxu1 %v5790_v49  ;;  %v5877_v48 = vld [vmem:[%s6694_s13 + $0x704] ss:$16 sps:$4 sm:$0xff]   ;;  %v5880_v49 = vld [vmem:[%s6694_s13 + $0x70c] ss:$16 sps:$4 sm:$0xff]  }
 0x11c   : > { %2057 = vmatpush1.bf16.msra.mxu0 %v5785_v50  ;;  %2229 = vmatpush1.bf16.msra.mxu1 %v5788_v51  ;;  %v5875_v50 = vld [vmem:[%s6694_s13 + $0x700] ss:$16 sps:$4 sm:$0xff]   ;;  %v5878_v51 = vld [vmem:[%s6694_s13 + $0x708] ss:$16 sps:$4 sm:$0xff]  }
 0x11d   : > { %2058 = vmatprep.subr.bf16.mxu0 %v5793_v52  ;;  %2230 = vmatprep.subr.bf16.mxu1 %v5796_v53  ;;  %v5883_v52 = vld [vmem:[%s6694_s13 + $0x724] ss:$16 sps:$4 sm:$0xff]   ;;  %v5886_v53 = vld [vmem:[%s6694_s13 + $0x72c] ss:$16 sps:$4 sm:$0xff]  }
 0x120   : > { %2059 = vmatpush1.bf16.msra.mxu0 %v5791_v54  ;;  %2231 = vmatpush1.bf16.msra.mxu1 %v5794_v55  ;;  %v5881_v54 = vld [vmem:[%s6694_s13 + $0x720] ss:$16 sps:$4 sm:$0xff]   ;;  %v5884_v55 = vld [vmem:[%s6694_s13 + $0x728] ss:$16 sps:$4 sm:$0xff]  }
 0x121   : > { %2060 = vmatprep.subr.bf16.mxu0 %v5799_v56  ;;  %2232 = vmatprep.subr.bf16.mxu1 %v5802_v57  ;;  %v5889_v56 = vld [vmem:[%s6694_s13 + $0x744] ss:$16 sps:$4 sm:$0xff]   ;;  %v5892_v57 = vld [vmem:[%s6694_s13 + $0x74c] ss:$16 sps:$4 sm:$0xff]  }
 0x124   : > { %2061 = vmatpush1.bf16.msra.mxu0 %v5797_v58  ;;  %2233 = vmatpush1.bf16.msra.mxu1 %v5800_v59  ;;  %v5887_v58 = vld [vmem:[%s6694_s13 + $0x740] ss:$16 sps:$4 sm:$0xff]   ;;  %v5890_v59 = vld [vmem:[%s6694_s13 + $0x748] ss:$16 sps:$4 sm:$0xff]  }
 0x125   : > { %2062 = vmatprep.subr.bf16.mxu0 %v5805_v60  ;;  %2234 = vmatprep.subr.bf16.mxu1 %v5808_v61  ;;  %v5895_v60 = vld [vmem:[%s6694_s13 + $0x764] ss:$16 sps:$4 sm:$0xff]   ;;  %v5898_v61 = vld [vmem:[%s6694_s13 + $0x76c] ss:$16 sps:$4 sm:$0xff]  }
 0x128   : > { %2063 = vmatpush1.bf16.msra.mxu0 %v5803_v62  ;;  %2235 = vmatpush1.bf16.msra.mxu1 %v5806_v63  ;;  %v5893_v62 = vld [vmem:[%s6694_s13 + $0x760] ss:$16 sps:$4 sm:$0xff]   ;;  %v5896_v63 = vld [vmem:[%s6694_s13 + $0x768] ss:$16 sps:$4 sm:$0xff]  }
 0x129   : > { %2064 = vmatprep.subr.bf16.mxu0 %v5811_v0  ;;  %2236 = vmatprep.subr.bf16.mxu1 %v5814_v1  ;;  %v5901_v0 = vld [vmem:[%s6694_s13 + $0x784] ss:$16 sps:$4 sm:$0xff]   ;;  %v5904_v1 = vld [vmem:[%s6694_s13 + $0x78c] ss:$16 sps:$4 sm:$0xff]  }
 0x12c   : > { %2065 = vmatpush1.bf16.msra.mxu0 %v5809_v2  ;;  %2237 = vmatpush1.bf16.msra.mxu1 %v5812_v3  ;;  %v5899_v2 = vld [vmem:[%s6694_s13 + $0x780] ss:$16 sps:$4 sm:$0xff]   ;;  %v5902_v3 = vld [vmem:[%s6694_s13 + $0x788] ss:$16 sps:$4 sm:$0xff]  }
 0x12d   : > { %2066 = vmatprep.subr.bf16.mxu0 %v5817_v4  ;;  %2238 = vmatprep.subr.bf16.mxu1 %v5820_v5  ;;  %v5907_v4 = vld [vmem:[%s6694_s13 + $0x7a4] ss:$16 sps:$4 sm:$0xff]   ;;  %v5910_v5 = vld [vmem:[%s6694_s13 + $0x7ac] ss:$16 sps:$4 sm:$0xff]  }
 0x130   : > { %2067 = vmatpush1.bf16.msra.mxu0 %v5815_v6  ;;  %2239 = vmatpush1.bf16.msra.mxu1 %v5818_v7  ;;  %v5905_v6 = vld [vmem:[%s6694_s13 + $0x7a0] ss:$16 sps:$4 sm:$0xff]   ;;  %v5908_v7 = vld [vmem:[%s6694_s13 + $0x7a8] ss:$16 sps:$4 sm:$0xff]  }
 0x131   : > { %2068 = vmatprep.subr.bf16.mxu0 %v5823_v8  ;;  %2240 = vmatprep.subr.bf16.mxu1 %v5826_v9  ;;  %v5913_v8 = vld [vmem:[%s6694_s13 + $0x7c4] ss:$16 sps:$4 sm:$0xff]   ;;  %v5916_v9 = vld [vmem:[%s6694_s13 + $0x7cc] ss:$16 sps:$4 sm:$0xff]  }
 0x134   : > { %2069 = vmatpush1.bf16.msra.mxu0 %v5821_v10  ;;  %2241 = vmatpush1.bf16.msra.mxu1 %v5824_v11  ;;  %v5911_v10 = vld [vmem:[%s6694_s13 + $0x7c0] ss:$16 sps:$4 sm:$0xff]   ;;  %v5914_v11 = vld [vmem:[%s6694_s13 + $0x7c8] ss:$16 sps:$4 sm:$0xff]  }
 0x135   : > { %2081 = vmatprep.subr.bf16.mxu0 %v5829_v12  ;;  %2253 = vmatprep.subr.bf16.mxu1 %v5832_v13  ;;  %v5919_v12 = vld [vmem:[%s6694_s13 + $0x7e4] ss:$16 sps:$4 sm:$0xff]   ;;  %v5922_v13 = vld [vmem:[%s6694_s13 + $0x7ec] ss:$16 sps:$4 sm:$0xff]  }
 0x137   : > { %2071 = vmatmul.mubr.bf16.vlgmr.msra.gmra.mrb[0].mxu0 %v4814_v14  ;;  %2243 = vmatmul.mubr.bf16.vlgmr.msra.gmra.mrb[0].mxu1 %v4814_v14  ;;  %v5917_v14 = vld [vmem:[%s6694_s13 + $0x7e0] ss:$16 sps:$4 sm:$0xff]  }
 0x138   : > { %2082 = vmatpush1.bf16.msra.mxu0 %v5827_v19  ;;  %2254 = vmatpush1.bf16.msra.mxu1 %v5830_v20  ;;  %v5920_v19 = vld [vmem:[%s6694_s13 + $0x7e8] ss:$16 sps:$4 sm:$0xff]   ;;  %v4816_v20 = vcombine.low %v6949_v17, %v6954_v18 }
 0x139   : > { %2083 = vmatprep.subr.bf16.mxu0 %v5835_v15  ;;  %2255 = vmatprep.subr.bf16.mxu1 %v5838_v16  ;;  %v356_v15 = vld [vmem:[#allocation2] sm:$0xff]  ;;  %v358_v16 = vld [vmem:[#allocation2 + $0x10] sm:$0xff] }
 0x13a   : > { %2113 = vmatprep.mubr.bf16.mxu0 %v4817_v21  ;;  %2285 = vmatprep.mubr.bf16.mxu1 %v4817_v21  ;;  %v357_v21 = vld [vmem:[#allocation2 + $0x8] sm:$0xff] }
 0x13c   : > { %2084 = vmatpush1.bf16.msra.mxu0 %v5833_v22  ;;  %2256 = vmatpush1.bf16.msra.mxu1 %v5836_v23  ;;  %v359_v22 = vld [vmem:[#allocation2 + $0x18] sm:$0xff] }
 0x13d   : > { %2085 = vmatprep.subr.bf16.mxu0 %v5841_v24  ;;  %2257 = vmatprep.subr.bf16.mxu1 %v5844_v25  ;;  %v360_v25 = vld [vmem:[#allocation2 + $0x20] sm:$0xff] }
 0x140   : > { %2086 = vmatpush1.bf16.msra.mxu0 %v5839_v26  ;;  %2258 = vmatpush1.bf16.msra.mxu1 %v5842_v27  ;;  %v362_v26 = vld [vmem:[#allocation2 + $0x30] sm:$0xff] }
 0x141   : > { %2087 = vmatprep.subr.bf16.mxu0 %v5847_v28  ;;  %2259 = vmatprep.subr.bf16.mxu1 %v5850_v29 }
 0x144   : > { %2088 = vmatpush1.bf16.msra.mxu0 %v5845_v30  ;;  %2260 = vmatpush1.bf16.msra.mxu1 %v5848_v31  ;;  %v361_v31 = vld [vmem:[#allocation2 + $0x28] sm:$0xff] }
 0x145   : > { %2089 = vmatprep.subr.bf16.mxu0 %v5853_v32  ;;  %2261 = vmatprep.subr.bf16.mxu1 %v5856_v33  ;;  %v363_v32 = vld [vmem:[#allocation2 + $0x38] sm:$0xff] }
 0x148   : > { %2090 = vmatpush1.bf16.msra.mxu0 %v5851_v34  ;;  %2262 = vmatpush1.bf16.msra.mxu1 %v5854_v35 }
 0x149   : > { %2091 = vmatprep.subr.bf16.mxu0 %v5859_v36  ;;  %2263 = vmatprep.subr.bf16.mxu1 %v5862_v37 }
 0x14c   : > { %2092 = vmatpush1.bf16.msra.mxu0 %v5857_v38  ;;  %2264 = vmatpush1.bf16.msra.mxu1 %v5860_v39 }
 0x14d   : > { %2093 = vmatprep.subr.bf16.mxu0 %v5865_v40  ;;  %2265 = vmatprep.subr.bf16.mxu1 %v5868_v41 }
 0x150   : > { %2094 = vmatpush1.bf16.msra.mxu0 %v5863_v42  ;;  %2266 = vmatpush1.bf16.msra.mxu1 %v5866_v43 }
 0x151   : > { %2095 = vmatprep.subr.bf16.mxu0 %v5871_v44  ;;  %2267 = vmatprep.subr.bf16.mxu1 %v5874_v45 }
 0x154   : > { %2096 = vmatpush1.bf16.msra.mxu0 %v5869_v46  ;;  %2268 = vmatpush1.bf16.msra.mxu1 %v5872_v47 }
 0x155   : > { %2097 = vmatprep.subr.bf16.mxu0 %v5877_v48  ;;  %2269 = vmatprep.subr.bf16.mxu1 %v5880_v49 }
 0x158   : > { %2098 = vmatpush1.bf16.msra.mxu0 %v5875_v50  ;;  %2270 = vmatpush1.bf16.msra.mxu1 %v5878_v51 }
 0x159   : > { %2099 = vmatprep.subr.bf16.mxu0 %v5883_v52  ;;  %2271 = vmatprep.subr.bf16.mxu1 %v5886_v53 }
 0x15c   : > { %2100 = vmatpush1.bf16.msra.mxu0 %v5881_v54  ;;  %2272 = vmatpush1.bf16.msra.mxu1 %v5884_v55 }
 0x15d   : > { %2101 = vmatprep.subr.bf16.mxu0 %v5889_v56  ;;  %2273 = vmatprep.subr.bf16.mxu1 %v5892_v57 }
 0x160   : > { %2102 = vmatpush1.bf16.msra.mxu0 %v5887_v58  ;;  %2274 = vmatpush1.bf16.msra.mxu1 %v5890_v59 }
 0x161   : > { %2103 = vmatprep.subr.bf16.mxu0 %v5895_v60  ;;  %2275 = vmatprep.subr.bf16.mxu1 %v5898_v61 }
 0x164   : > { %2104 = vmatpush1.bf16.msra.mxu0 %v5893_v62  ;;  %2276 = vmatpush1.bf16.msra.mxu1 %v5896_v63 }
 0x165   : > { %2105 = vmatprep.subr.bf16.mxu0 %v5901_v0  ;;  %2277 = vmatprep.subr.bf16.mxu1 %v5904_v1 }
 0x168   : > { %2106 = vmatpush1.bf16.msra.mxu0 %v5899_v2  ;;  %2278 = vmatpush1.bf16.msra.mxu1 %v5902_v3 }
 0x169   : > { %2107 = vmatprep.subr.bf16.mxu0 %v5907_v4  ;;  %2279 = vmatprep.subr.bf16.mxu1 %v5910_v5 }
 0x16c   : > { %2108 = vmatpush1.bf16.msra.mxu0 %v5905_v6  ;;  %2280 = vmatpush1.bf16.msra.mxu1 %v5908_v7 }
 0x16d   : > { %2109 = vmatprep.subr.bf16.mxu0 %v5913_v8  ;;  %2281 = vmatprep.subr.bf16.mxu1 %v5916_v9 }
 0x170   : > { %2110 = vmatpush1.bf16.msra.mxu0 %v5911_v10  ;;  %2282 = vmatpush1.bf16.msra.mxu1 %v5914_v11 }
 0x171   : > { %2111 = vmatprep.subr.bf16.mxu0 %v5919_v12  ;;  %2283 = vmatprep.subr.bf16.mxu1 %v5922_v13 }
 0x174   : > { %2112 = vmatpush1.bf16.msra.mxu0 %v5917_v14  ;;  %2284 = vmatpush1.bf16.msra.mxu1 %v5920_v19 }
 0x177   : > { %2114 = vmatmul.mubr.bf16.vlgmr.msra.gmra.mrb[0].mxu0 %v4816_v20  ;;  %2286 = vmatmul.mubr.bf16.vlgmr.msra.gmra.mrb[0].mxu1 %v4816_v20 }
 0x24a   : > { %v2115_v23 = vpop.f32.mrb[0].mxu0  ;;  %v2287_v24 = vpop.f32.mrb[0].mxu1 }
 0x24b   : > { %v2296_v27 = vadd.f32 %v2115_v23, %v356_v15  ;;  %v2298_v28 = vadd.f32 %v2287_v24, %v358_v16  ;;  %v2117_v29 = vpop.f32.mrb[1].mxu0  ;;  %v2289_v30 = vpop.f32.mrb[1].mxu1 }
 0x24c   : > { %v2297_v33 = vadd.f32 %v2117_v29, %v357_v21  ;;  %v2299_v17 = vadd.f32 %v2289_v30, %v359_v22  ;;  %v2119_v18 = vpop.f32.mrb[2].mxu0  ;;  %v2291_v34 = vpop.f32.mrb[2].mxu1 }
 0x24d   : > { %2304 = vst [vmem:[#allocation2] sm:$0xff] %v2296_v27  ;;  %2306 = vst [vmem:[#allocation2 + $0x10] sm:$0xff] %v2298_v28  ;;  %v2300_v35 = vadd.f32 %v2119_v18, %v360_v25  ;;  %v2302_v36 = vadd.f32 %v2291_v34, %v362_v26  ;;  %v2121_v37 = vpop.f32.mrb[3].mxu0  ;;  %v2293_v38 = vpop.f32.mrb[3].mxu1 }
 0x24e   : > { %2305 = vst [vmem:[#allocation2 + $0x8] sm:$0xff] %v2297_v33  ;;  %2307 = vst [vmem:[#allocation2 + $0x18] sm:$0xff] %v2299_v17  ;;  %v2301_v39 = vadd.f32 %v2121_v37, %v361_v31  ;;  %v2303_v40 = vadd.f32 %v2293_v38, %v363_v32 }
 0x24f   : > { %2308 = vst [vmem:[#allocation2 + $0x20] sm:$0xff] %v2300_v35  ;;  %2310 = vst [vmem:[#allocation2 + $0x30] sm:$0xff] %v2302_v36 }
 0x250   : > { %2309 = vst [vmem:[#allocation2 + $0x28] sm:$0xff] %v2301_v39  ;;  %2311 = vst [vmem:[#allocation2 + $0x38] sm:$0xff] %v2303_v40 }
 0x251 PF: > { %p5074_p13 = scmp.ne.s32.totalorder %s6475_s21, 1 }
 0x252   : > { %v5923_v41 = vld [vmem:[%s6694_s13 + $0x4] ss:$16 sps:$4 sm:$0xff] (!%p5074_p13)   ;;  %v5925_v42 = vld [vmem:[%s6694_s13 + $0xc] ss:$16 sps:$4 sm:$0xff] (!%p5074_p13)   ;;  %v5927_v43 = vld [vmem:[%s6694_s13] ss:$16 sps:$4 sm:$0xff] (!%p5074_p13)  }
 0x253   : > { %2315 = sbr.rel (%p5074_p13) target bundleno = 1069 (0x42d), region = 64  ;;  %3912 = vmatprep.subr.bf16.mxu0 (!%p5074_p13), %v5923_v41  ;;  %v5928_v44 = vld [vmem:[%s6694_s13 + $0x8] ss:$16 sps:$4 sm:$0xff] (!%p5074_p13)   ;;  %4084 = vmatprep.subr.bf16.mxu1 (!%p5074_p13), %v5925_v42  ;;  %v5929_v45 = vld [vmem:[%s6694_s13 + $0x24] ss:$16 sps:$4 sm:$0xff] (!%p5074_p13)  }
 0x254   : > { %3913 = vmatpush1.bf16.msra.mxu0 (!%p5074_p13), %v5927_v43  ;;  %4085 = vmatpush1.bf16.msra.mxu1 (!%p5074_p13), %v5928_v44  ;;  %v5931_v46 = vld [vmem:[%s6694_s13 + $0x2c] ss:$16 sps:$4 sm:$0xff] (!%p5074_p13)   ;;  %v5933_v47 = vld [vmem:[%s6694_s13 + $0x20] ss:$16 sps:$4 sm:$0xff] (!%p5074_p13)   ;;  %v5934_v48 = vld [vmem:[%s6694_s13 + $0x28] ss:$16 sps:$4 sm:$0xff] (!%p5074_p13)  }
 0x255   : > { %3914 = vmatprep.subr.bf16.mxu0 (!%p5074_p13), %v5929_v45  ;;  %4086 = vmatprep.subr.bf16.mxu1 (!%p5074_p13), %v5931_v46  ;;  %v5935_v49 = vld [vmem:[%s6694_s13 + $0x44] ss:$16 sps:$4 sm:$0xff] (!%p5074_p13)   ;;  %v5937_v50 = vld [vmem:[%s6694_s13 + $0x4c] ss:$16 sps:$4 sm:$0xff] (!%p5074_p13)   ;;  %v5939_v51 = vld [vmem:[%s6694_s13 + $0x40] ss:$16 sps:$4 sm:$0xff] (!%p5074_p13)  }
 0x256   : > { %v5940_v52 = vld [vmem:[%s6694_s13 + $0x48] ss:$16 sps:$4 sm:$0xff] (!%p5074_p13)   ;;  %v5941_v53 = vld [vmem:[%s6694_s13 + $0x64] ss:$16 sps:$4 sm:$0xff] (!%p5074_p13)   ;;  %v5943_v54 = vld [vmem:[%s6694_s13 + $0x6c] ss:$16 sps:$4 sm:$0xff] (!%p5074_p13)  }
 0x257   : > { %v5945_v55 = vld [vmem:[%s6694_s13 + $0x60] ss:$16 sps:$4 sm:$0xff] (!%p5074_p13)   ;;  %v5946_v56 = vld [vmem:[%s6694_s13 + $0x68] ss:$16 sps:$4 sm:$0xff] (!%p5074_p13)   ;;  %v5947_v57 = vld [vmem:[%s6694_s13 + $0x84] ss:$16 sps:$4 sm:$0xff] (!%p5074_p13)  }
 0x258   : > { %3915 = vmatpush1.bf16.msra.mxu0 (!%p5074_p13), %v5933_v47  ;;  %4087 = vmatpush1.bf16.msra.mxu1 (!%p5074_p13), %v5934_v48  ;;  %v5949_v58 = vld [vmem:[%s6694_s13 + $0x8c] ss:$16 sps:$4 sm:$0xff] (!%p5074_p13)   ;;  %v5951_v59 = vld [vmem:[%s6694_s13 + $0x80] ss:$16 sps:$4 sm:$0xff] (!%p5074_p13)   ;;  %v5952_v60 = vld [vmem:[%s6694_s13 + $0x88] ss:$16 sps:$4 sm:$0xff] (!%p5074_p13)  }
 0x259   : > { %3916 = vmatprep.subr.bf16.mxu0 (!%p5074_p13), %v5935_v49  ;;  %4088 = vmatprep.subr.bf16.mxu1 (!%p5074_p13), %v5937_v50  ;;  %v5953_v61 = vld [vmem:[%s6694_s13 + $0xa4] ss:$16 sps:$4 sm:$0xff] (!%p5074_p13)   ;;  %v5955_v62 = vld [vmem:[%s6694_s13 + $0xac] ss:$16 sps:$4 sm:$0xff] (!%p5074_p13)   ;;  %v5957_v63 = vld [vmem:[%s6694_s13 + $0xa0] ss:$16 sps:$4 sm:$0xff] (!%p5074_p13)  }
 0x25a   : > { %v5958_v0 = vld [vmem:[%s6694_s13 + $0xa8] ss:$16 sps:$4 sm:$0xff]   ;;  %v5959_v1 = vld [vmem:[%s6694_s13 + $0xc4] ss:$16 sps:$4 sm:$0xff]   ;;  %v5961_v2 = vld [vmem:[%s6694_s13 + $0xcc] ss:$16 sps:$4 sm:$0xff]  }
 0x25b   : > { %v5963_v3 = vld [vmem:[%s6694_s13 + $0xc0] ss:$16 sps:$4 sm:$0xff]   ;;  %v5964_v4 = vld [vmem:[%s6694_s13 + $0xc8] ss:$16 sps:$4 sm:$0xff]   ;;  %v5965_v5 = vld [vmem:[%s6694_s13 + $0xe4] ss:$16 sps:$4 sm:$0xff]  }
 0x25c   : > { %3917 = vmatpush1.bf16.msra.mxu0 %v5939_v51  ;;  %4089 = vmatpush1.bf16.msra.mxu1 %v5940_v52  ;;  %v5967_v6 = vld [vmem:[%s6694_s13 + $0xec] ss:$16 sps:$4 sm:$0xff]   ;;  %v5969_v7 = vld [vmem:[%s6694_s13 + $0xe0] ss:$16 sps:$4 sm:$0xff]   ;;  %v5970_v8 = vld [vmem:[%s6694_s13 + $0xe8] ss:$16 sps:$4 sm:$0xff]  }
 0x25d   : > { %3918 = vmatprep.subr.bf16.mxu0 %v5941_v53  ;;  %4090 = vmatprep.subr.bf16.mxu1 %v5943_v54  ;;  %v5971_v9 = vld [vmem:[%s6694_s13 + $0x104] ss:$16 sps:$4 sm:$0xff]   ;;  %v5973_v10 = vld [vmem:[%s6694_s13 + $0x10c] ss:$16 sps:$4 sm:$0xff]   ;;  %v5975_v11 = vld [vmem:[%s6694_s13 + $0x100] ss:$16 sps:$4 sm:$0xff]  }
 0x25e   : > { %v5976_v12 = vld [vmem:[%s6694_s13 + $0x108] ss:$16 sps:$4 sm:$0xff]   ;;  %v5977_v13 = vld [vmem:[%s6694_s13 + $0x124] ss:$16 sps:$4 sm:$0xff]   ;;  %v5979_v14 = vld [vmem:[%s6694_s13 + $0x12c] ss:$16 sps:$4 sm:$0xff]  }
 0x25f   : > { %v5981_v19 = vld [vmem:[%s6694_s13 + $0x120] ss:$16 sps:$4 sm:$0xff]   ;;  %v5982_v20 = vld [vmem:[%s6694_s13 + $0x128] ss:$16 sps:$4 sm:$0xff]   ;;  %v5983_v15 = vld [vmem:[%s6694_s13 + $0x144] ss:$16 sps:$4 sm:$0xff]  }
 0x260   : > { %3919 = vmatpush1.bf16.msra.mxu0 %v5945_v55  ;;  %4091 = vmatpush1.bf16.msra.mxu1 %v5946_v56  ;;  %v5985_v16 = vld [vmem:[%s6694_s13 + $0x14c] ss:$16 sps:$4 sm:$0xff]   ;;  %v5987_v21 = vld [vmem:[%s6694_s13 + $0x140] ss:$16 sps:$4 sm:$0xff]   ;;  %v5988_v22 = vld [vmem:[%s6694_s13 + $0x148] ss:$16 sps:$4 sm:$0xff]  }
 0x261   : > { %3920 = vmatprep.subr.bf16.mxu0 %v5947_v57  ;;  %4092 = vmatprep.subr.bf16.mxu1 %v5949_v58  ;;  %v5989_v23 = vld [vmem:[%s6694_s13 + $0x164] ss:$16 sps:$4 sm:$0xff]   ;;  %v5991_v24 = vld [vmem:[%s6694_s13 + $0x16c] ss:$16 sps:$4 sm:$0xff]   ;;  %v5993_v27 = vld [vmem:[%s6694_s13 + $0x160] ss:$16 sps:$4 sm:$0xff]  }
 0x262   : > { %v2328_v25 = vld [vmem:[%s7381_s1] sm:$0xff]  ;;  %v5994_v28 = vld [vmem:[%s6694_s13 + $0x168] ss:$16 sps:$4 sm:$0xff]   ;;  %v5997_v31 = vld [vmem:[%s6694_s13 + $0x18c] ss:$16 sps:$4 sm:$0xff]  }
 0x263   : > { %v2332_v26 = vld [vmem:[%s7381_s1 + $0x20] sm:$0xff]  ;;  %v6000_v33 = vld [vmem:[%s6694_s13 + $0x188] ss:$16 sps:$4 sm:$0xff]   ;;  %v6003_v18 = vld [vmem:[%s6694_s13 + $0x1ac] ss:$16 sps:$4 sm:$0xff]  }
 0x264   : > { %3921 = vmatpush1.bf16.msra.mxu0 %v5951_v59  ;;  %4093 = vmatpush1.bf16.msra.mxu1 %v5952_v60  ;;  %v5076_v29 = vcombine.high %v2328_v25, %v2332_v26  ;;  %v5995_v30 = vld [vmem:[%s6694_s13 + $0x184] ss:$16 sps:$4 sm:$0xff]   ;;  %v5999_v32 = vld [vmem:[%s6694_s13 + $0x180] ss:$16 sps:$4 sm:$0xff]   ;;  %v6006_v35 = vld [vmem:[%s6694_s13 + $0x1a8] ss:$16 sps:$4 sm:$0xff]   ;;  %v5075_v46 = vcombine.low %v2328_v25, %v2332_v26 }
 0x265   : > { %3922 = vmatprep.subr.bf16.mxu0 %v5953_v61  ;;  %4094 = vmatprep.subr.bf16.mxu1 %v5955_v62  ;;  %v6001_v17 = vld [vmem:[%s6694_s13 + $0x1a4] ss:$16 sps:$4 sm:$0xff]   ;;  %v6005_v34 = vld [vmem:[%s6694_s13 + $0x1a0] ss:$16 sps:$4 sm:$0xff]   ;;  %v6009_v37 = vld [vmem:[%s6694_s13 + $0x1cc] ss:$16 sps:$4 sm:$0xff]  }
 0x266   : > { %3944 = vmatprep.mubr.bf16.mxu0 %v5076_v29  ;;  %4116 = vmatprep.mubr.bf16.mxu1 %v5076_v29  ;;  %v6007_v36 = vld [vmem:[%s6694_s13 + $0x1c4] ss:$16 sps:$4 sm:$0xff]   ;;  %v6011_v38 = vld [vmem:[%s6694_s13 + $0x1c0] ss:$16 sps:$4 sm:$0xff]   ;;  %v6012_v39 = vld [vmem:[%s6694_s13 + $0x1c8] ss:$16 sps:$4 sm:$0xff]  }
 0x267   : > { %v6013_v40 = vld [vmem:[%s6694_s13 + $0x1e4] ss:$16 sps:$4 sm:$0xff]   ;;  %v6015_v41 = vld [vmem:[%s6694_s13 + $0x1ec] ss:$16 sps:$4 sm:$0xff]   ;;  %v6017_v42 = vld [vmem:[%s6694_s13 + $0x1e0] ss:$16 sps:$4 sm:$0xff]  }
 0x268   : > { %3923 = vmatpush1.bf16.msra.mxu0 %v5957_v63  ;;  %4095 = vmatpush1.bf16.msra.mxu1 %v5958_v0  ;;  %v6018_v43 = vld [vmem:[%s6694_s13 + $0x1e8] ss:$16 sps:$4 sm:$0xff]   ;;  %v6021_v44 = vld [vmem:[%s6694_s13 + $0x204] ss:$16 sps:$4 sm:$0xff]   ;;  %v6024_v45 = vld [vmem:[%s6694_s13 + $0x20c] ss:$16 sps:$4 sm:$0xff]  }
 0x269   : > { %3924 = vmatprep.subr.bf16.mxu0 %v5959_v1  ;;  %4096 = vmatprep.subr.bf16.mxu1 %v5961_v2  ;;  %v6019_v47 = vld [vmem:[%s6694_s13 + $0x200] ss:$16 sps:$4 sm:$0xff]   ;;  %v6022_v48 = vld [vmem:[%s6694_s13 + $0x208] ss:$16 sps:$4 sm:$0xff]   ;;  %v6027_v49 = vld [vmem:[%s6694_s13 + $0x224] ss:$16 sps:$4 sm:$0xff]  }
 0x26a   : > { %v6030_v50 = vld [vmem:[%s6694_s13 + $0x22c] ss:$16 sps:$4 sm:$0xff]   ;;  %v6025_v51 = vld [vmem:[%s6694_s13 + $0x220] ss:$16 sps:$4 sm:$0xff]   ;;  %v6028_v52 = vld [vmem:[%s6694_s13 + $0x228] ss:$16 sps:$4 sm:$0xff]  }
 0x26b   : > { %v6033_v53 = vld [vmem:[%s6694_s13 + $0x244] ss:$16 sps:$4 sm:$0xff]   ;;  %v6036_v54 = vld [vmem:[%s6694_s13 + $0x24c] ss:$16 sps:$4 sm:$0xff]   ;;  %v6031_v55 = vld [vmem:[%s6694_s13 + $0x240] ss:$16 sps:$4 sm:$0xff]  }
 0x26c   : > { %3925 = vmatpush1.bf16.msra.mxu0 %v5963_v3  ;;  %4097 = vmatpush1.bf16.msra.mxu1 %v5964_v4  ;;  %v6034_v56 = vld [vmem:[%s6694_s13 + $0x248] ss:$16 sps:$4 sm:$0xff]   ;;  %v6039_v57 = vld [vmem:[%s6694_s13 + $0x264] ss:$16 sps:$4 sm:$0xff]   ;;  %v6042_v58 = vld [vmem:[%s6694_s13 + $0x26c] ss:$16 sps:$4 sm:$0xff]  }
 0x26d   : > { %3926 = vmatprep.subr.bf16.mxu0 %v5965_v5  ;;  %4098 = vmatprep.subr.bf16.mxu1 %v5967_v6  ;;  %v6037_v59 = vld [vmem:[%s6694_s13 + $0x260] ss:$16 sps:$4 sm:$0xff]   ;;  %v6040_v60 = vld [vmem:[%s6694_s13 + $0x268] ss:$16 sps:$4 sm:$0xff]   ;;  %v6045_v61 = vld [vmem:[%s6694_s13 + $0x284] ss:$16 sps:$4 sm:$0xff]  }
 0x26e   : > { %v6048_v62 = vld [vmem:[%s6694_s13 + $0x28c] ss:$16 sps:$4 sm:$0xff]   ;;  %v6043_v63 = vld [vmem:[%s6694_s13 + $0x280] ss:$16 sps:$4 sm:$0xff]   ;;  %v6046_v0 = vld [vmem:[%s6694_s13 + $0x288] ss:$16 sps:$4 sm:$0xff]  }
 0x26f   : > { %v6051_v1 = vld [vmem:[%s6694_s13 + $0x2a4] ss:$16 sps:$4 sm:$0xff]   ;;  %v6054_v2 = vld [vmem:[%s6694_s13 + $0x2ac] ss:$16 sps:$4 sm:$0xff]   ;;  %v6049_v3 = vld [vmem:[%s6694_s13 + $0x2a0] ss:$16 sps:$4 sm:$0xff]  }
 0x270   : > { %3927 = vmatpush1.bf16.msra.mxu0 %v5969_v7  ;;  %4099 = vmatpush1.bf16.msra.mxu1 %v5970_v8  ;;  %v6052_v4 = vld [vmem:[%s6694_s13 + $0x2a8] ss:$16 sps:$4 sm:$0xff]   ;;  %v6057_v5 = vld [vmem:[%s6694_s13 + $0x2c4] ss:$16 sps:$4 sm:$0xff]   ;;  %v6060_v6 = vld [vmem:[%s6694_s13 + $0x2cc] ss:$16 sps:$4 sm:$0xff]  }
 0x271   : > { %3928 = vmatprep.subr.bf16.mxu0 %v5971_v9  ;;  %4100 = vmatprep.subr.bf16.mxu1 %v5973_v10  ;;  %v7122_v7 = vld [vmem:[%s7381_s1 + $0x8] sm:$0xff]  ;;  %v6055_v9 = vld [vmem:[%s6694_s13 + $0x2c0] ss:$16 sps:$4 sm:$0xff]   ;;  %v6081_v26 = vld [vmem:[%s6694_s13 + $0x344] ss:$16 sps:$4 sm:$0xff]  }
 0x272   : > { %v7127_v8 = vld [vmem:[%s7381_s1 + $0x28] sm:$0xff] }
 0x273   : > { %v6058_v10 = vld [vmem:[%s6694_s13 + $0x2c8] ss:$16 sps:$4 sm:$0xff]  }
 0x274   : > { %3929 = vmatpush1.bf16.msra.mxu0 %v5975_v11  ;;  %4101 = vmatpush1.bf16.msra.mxu1 %v5976_v12  ;;  %v5078_v11 = vcombine.high %v7122_v7, %v7127_v8  ;;  %v6063_v12 = vld [vmem:[%s6694_s13 + $0x2e4] ss:$16 sps:$4 sm:$0xff]   ;;  %v6076_v25 = vld [vmem:[%s6694_s13 + $0x328] ss:$16 sps:$4 sm:$0xff]  }
 0x275   : > { %3930 = vmatprep.subr.bf16.mxu0 %v5977_v13  ;;  %4102 = vmatprep.subr.bf16.mxu1 %v5979_v14  ;;  %v6066_v13 = vld [vmem:[%s6694_s13 + $0x2ec] ss:$16 sps:$4 sm:$0xff]   ;;  %v6061_v14 = vld [vmem:[%s6694_s13 + $0x2e0] ss:$16 sps:$4 sm:$0xff]   ;;  %v6082_v29 = vld [vmem:[%s6694_s13 + $0x348] ss:$16 sps:$4 sm:$0xff]  }
 0x278   : > { %3931 = vmatpush1.bf16.msra.mxu0 %v5981_v19  ;;  %4103 = vmatpush1.bf16.msra.mxu1 %v5982_v20  ;;  %v6064_v19 = vld [vmem:[%s6694_s13 + $0x2e8] ss:$16 sps:$4 sm:$0xff]   ;;  %v6069_v20 = vld [vmem:[%s6694_s13 + $0x304] ss:$16 sps:$4 sm:$0xff]  }
 0x279   : > { %3932 = vmatprep.subr.bf16.mxu0 %v5983_v15  ;;  %4104 = vmatprep.subr.bf16.mxu1 %v5985_v16  ;;  %v6072_v15 = vld [vmem:[%s6694_s13 + $0x30c] ss:$16 sps:$4 sm:$0xff]   ;;  %v6067_v16 = vld [vmem:[%s6694_s13 + $0x300] ss:$16 sps:$4 sm:$0xff]  }
 0x27c   : > { %3933 = vmatpush1.bf16.msra.mxu0 %v5987_v21  ;;  %4105 = vmatpush1.bf16.msra.mxu1 %v5988_v22  ;;  %v6070_v21 = vld [vmem:[%s6694_s13 + $0x308] ss:$16 sps:$4 sm:$0xff]   ;;  %v6075_v22 = vld [vmem:[%s6694_s13 + $0x324] ss:$16 sps:$4 sm:$0xff]  }
 0x27d   : > { %3934 = vmatprep.subr.bf16.mxu0 %v5989_v23  ;;  %4106 = vmatprep.subr.bf16.mxu1 %v5991_v24  ;;  %v6078_v23 = vld [vmem:[%s6694_s13 + $0x32c] ss:$16 sps:$4 sm:$0xff]   ;;  %v6073_v24 = vld [vmem:[%s6694_s13 + $0x320] ss:$16 sps:$4 sm:$0xff]  }
 0x280   : > { %3935 = vmatpush1.bf16.msra.mxu0 %v5993_v27  ;;  %4107 = vmatpush1.bf16.msra.mxu1 %v5994_v28  ;;  %v6084_v27 = vld [vmem:[%s6694_s13 + $0x34c] ss:$16 sps:$4 sm:$0xff]   ;;  %v6079_v28 = vld [vmem:[%s6694_s13 + $0x340] ss:$16 sps:$4 sm:$0xff]  }
 0x281   : > { %3936 = vmatprep.subr.bf16.mxu0 %v5995_v30  ;;  %4108 = vmatprep.subr.bf16.mxu1 %v5997_v31  ;;  %v6087_v30 = vld [vmem:[%s6694_s13 + $0x364] ss:$16 sps:$4 sm:$0xff]   ;;  %v6090_v31 = vld [vmem:[%s6694_s13 + $0x36c] ss:$16 sps:$4 sm:$0xff]  }
 0x284   : > { %3937 = vmatpush1.bf16.msra.mxu0 %v5999_v32  ;;  %4109 = vmatpush1.bf16.msra.mxu1 %v6000_v33  ;;  %v6085_v32 = vld [vmem:[%s6694_s13 + $0x360] ss:$16 sps:$4 sm:$0xff]   ;;  %v6088_v33 = vld [vmem:[%s6694_s13 + $0x368] ss:$16 sps:$4 sm:$0xff]  }
 0x285   : > { %3938 = vmatprep.subr.bf16.mxu0 %v6001_v17  ;;  %4110 = vmatprep.subr.bf16.mxu1 %v6003_v18  ;;  %v6093_v17 = vld [vmem:[%s6694_s13 + $0x384] ss:$16 sps:$4 sm:$0xff]   ;;  %v6096_v18 = vld [vmem:[%s6694_s13 + $0x38c] ss:$16 sps:$4 sm:$0xff]  }
 0x288   : > { %3939 = vmatpush1.bf16.msra.mxu0 %v6005_v34  ;;  %4111 = vmatpush1.bf16.msra.mxu1 %v6006_v35  ;;  %v6091_v34 = vld [vmem:[%s6694_s13 + $0x380] ss:$16 sps:$4 sm:$0xff]   ;;  %v6094_v35 = vld [vmem:[%s6694_s13 + $0x388] ss:$16 sps:$4 sm:$0xff]  }
 0x289   : > { %3940 = vmatprep.subr.bf16.mxu0 %v6007_v36  ;;  %4112 = vmatprep.subr.bf16.mxu1 %v6009_v37  ;;  %v6099_v36 = vld [vmem:[%s6694_s13 + $0x3a4] ss:$16 sps:$4 sm:$0xff]   ;;  %v6102_v37 = vld [vmem:[%s6694_s13 + $0x3ac] ss:$16 sps:$4 sm:$0xff]  }
 0x28c   : > { %3941 = vmatpush1.bf16.msra.mxu0 %v6011_v38  ;;  %4113 = vmatpush1.bf16.msra.mxu1 %v6012_v39  ;;  %v6097_v38 = vld [vmem:[%s6694_s13 + $0x3a0] ss:$16 sps:$4 sm:$0xff]   ;;  %v6100_v39 = vld [vmem:[%s6694_s13 + $0x3a8] ss:$16 sps:$4 sm:$0xff]  }
 0x28d   : > { %3942 = vmatprep.subr.bf16.mxu0 %v6013_v40  ;;  %4114 = vmatprep.subr.bf16.mxu1 %v6015_v41  ;;  %v6105_v40 = vld [vmem:[%s6694_s13 + $0x3c4] ss:$16 sps:$4 sm:$0xff]   ;;  %v6108_v41 = vld [vmem:[%s6694_s13 + $0x3cc] ss:$16 sps:$4 sm:$0xff]  }
 0x290   : > { %3943 = vmatpush1.bf16.msra.mxu0 %v6017_v42  ;;  %4115 = vmatpush1.bf16.msra.mxu1 %v6018_v43  ;;  %v6103_v42 = vld [vmem:[%s6694_s13 + $0x3c0] ss:$16 sps:$4 sm:$0xff]   ;;  %v6106_v43 = vld [vmem:[%s6694_s13 + $0x3c8] ss:$16 sps:$4 sm:$0xff]  }
 0x291   : > { %3955 = vmatprep.subr.bf16.mxu0 %v6021_v44  ;;  %4127 = vmatprep.subr.bf16.mxu1 %v6024_v45  ;;  %v6111_v44 = vld [vmem:[%s6694_s13 + $0x3e4] ss:$16 sps:$4 sm:$0xff]   ;;  %v6114_v45 = vld [vmem:[%s6694_s13 + $0x3ec] ss:$16 sps:$4 sm:$0xff]  }
 0x293   : > { %3945 = vmatmul.mubr.bf16.vlgmr.msra.gmra.mrb[0].mxu0 %v5075_v46  ;;  %4117 = vmatmul.mubr.bf16.vlgmr.msra.gmra.mrb[0].mxu1 %v5075_v46  ;;  %v6109_v46 = vld [vmem:[%s6694_s13 + $0x3e0] ss:$16 sps:$4 sm:$0xff]  }
 0x294   : > { %3956 = vmatpush1.bf16.msra.mxu0 %v6019_v47  ;;  %4128 = vmatpush1.bf16.msra.mxu1 %v6022_v48  ;;  %v6112_v47 = vld [vmem:[%s6694_s13 + $0x3e8] ss:$16 sps:$4 sm:$0xff]   ;;  %v6117_v48 = vld [vmem:[%s6694_s13 + $0x404] ss:$16 sps:$4 sm:$0xff]  }
 0x295   : > { %3957 = vmatprep.subr.bf16.mxu0 %v6027_v49  ;;  %4129 = vmatprep.subr.bf16.mxu1 %v6030_v50  ;;  %v6120_v49 = vld [vmem:[%s6694_s13 + $0x40c] ss:$16 sps:$4 sm:$0xff]   ;;  %v5077_v50 = vcombine.low %v7122_v7, %v7127_v8  ;;  %v6142_v7 = vld [vmem:[%s6694_s13 + $0x488] ss:$16 sps:$4 sm:$0xff]   ;;  %v6147_v8 = vld [vmem:[%s6694_s13 + $0x4a4] ss:$16 sps:$4 sm:$0xff]  }
 0x296   : > { %3987 = vmatprep.mubr.bf16.mxu0 %v5078_v11  ;;  %4159 = vmatprep.mubr.bf16.mxu1 %v5078_v11  ;;  %v6148_v11 = vld [vmem:[%s6694_s13 + $0x4a8] ss:$16 sps:$4 sm:$0xff]  }
 0x298   : > { %3958 = vmatpush1.bf16.msra.mxu0 %v6025_v51  ;;  %4130 = vmatpush1.bf16.msra.mxu1 %v6028_v52  ;;  %v6115_v51 = vld [vmem:[%s6694_s13 + $0x400] ss:$16 sps:$4 sm:$0xff]   ;;  %v6118_v52 = vld [vmem:[%s6694_s13 + $0x408] ss:$16 sps:$4 sm:$0xff]  }
 0x299   : > { %3959 = vmatprep.subr.bf16.mxu0 %v6033_v53  ;;  %4131 = vmatprep.subr.bf16.mxu1 %v6036_v54  ;;  %v6123_v53 = vld [vmem:[%s6694_s13 + $0x424] ss:$16 sps:$4 sm:$0xff]   ;;  %v6126_v54 = vld [vmem:[%s6694_s13 + $0x42c] ss:$16 sps:$4 sm:$0xff]  }
 0x29c   : > { %3960 = vmatpush1.bf16.msra.mxu0 %v6031_v55  ;;  %4132 = vmatpush1.bf16.msra.mxu1 %v6034_v56  ;;  %v7180_v55 = vld [vmem:[%s7381_s1 + $0x10] sm:$0xff] }
 0x29d   : > { %3961 = vmatprep.subr.bf16.mxu0 %v6039_v57  ;;  %4133 = vmatprep.subr.bf16.mxu1 %v6042_v58  ;;  %v7185_v56 = vld [vmem:[%s7381_s1 + $0x30] sm:$0xff] }
 0x29e   : > { %v5080_v57 = vcombine.high %v7180_v55, %v7185_v56  ;;  %v6121_v58 = vld [vmem:[%s6694_s13 + $0x420] ss:$16 sps:$4 sm:$0xff]  }
 0x2a0   : > { %3962 = vmatpush1.bf16.msra.mxu0 %v6037_v59  ;;  %4134 = vmatpush1.bf16.msra.mxu1 %v6040_v60  ;;  %v6124_v59 = vld [vmem:[%s6694_s13 + $0x428] ss:$16 sps:$4 sm:$0xff]   ;;  %v6129_v60 = vld [vmem:[%s6694_s13 + $0x444] ss:$16 sps:$4 sm:$0xff]  }
 0x2a1   : > { %3963 = vmatprep.subr.bf16.mxu0 %v6045_v61  ;;  %4135 = vmatprep.subr.bf16.mxu1 %v6048_v62  ;;  %v6132_v61 = vld [vmem:[%s6694_s13 + $0x44c] ss:$16 sps:$4 sm:$0xff]   ;;  %v6127_v62 = vld [vmem:[%s6694_s13 + $0x440] ss:$16 sps:$4 sm:$0xff]  }
 0x2a4   : > { %3964 = vmatpush1.bf16.msra.mxu0 %v6043_v63  ;;  %4136 = vmatpush1.bf16.msra.mxu1 %v6046_v0  ;;  %v6130_v63 = vld [vmem:[%s6694_s13 + $0x448] ss:$16 sps:$4 sm:$0xff]   ;;  %v6135_v0 = vld [vmem:[%s6694_s13 + $0x464] ss:$16 sps:$4 sm:$0xff]  }
 0x2a5   : > { %3965 = vmatprep.subr.bf16.mxu0 %v6051_v1  ;;  %4137 = vmatprep.subr.bf16.mxu1 %v6054_v2  ;;  %v6138_v1 = vld [vmem:[%s6694_s13 + $0x46c] ss:$16 sps:$4 sm:$0xff]   ;;  %v6133_v2 = vld [vmem:[%s6694_s13 + $0x460] ss:$16 sps:$4 sm:$0xff]  }
 0x2a8   : > { %3966 = vmatpush1.bf16.msra.mxu0 %v6049_v3  ;;  %4138 = vmatpush1.bf16.msra.mxu1 %v6052_v4  ;;  %v6136_v3 = vld [vmem:[%s6694_s13 + $0x468] ss:$16 sps:$4 sm:$0xff]   ;;  %v6141_v4 = vld [vmem:[%s6694_s13 + $0x484] ss:$16 sps:$4 sm:$0xff]  }
 0x2a9   : > { %3967 = vmatprep.subr.bf16.mxu0 %v6057_v5  ;;  %4139 = vmatprep.subr.bf16.mxu1 %v6060_v6  ;;  %v6144_v5 = vld [vmem:[%s6694_s13 + $0x48c] ss:$16 sps:$4 sm:$0xff]   ;;  %v6139_v6 = vld [vmem:[%s6694_s13 + $0x480] ss:$16 sps:$4 sm:$0xff]  }
 0x2ac   : > { %3968 = vmatpush1.bf16.msra.mxu0 %v6055_v9  ;;  %4140 = vmatpush1.bf16.msra.mxu1 %v6058_v10  ;;  %v6150_v9 = vld [vmem:[%s6694_s13 + $0x4ac] ss:$16 sps:$4 sm:$0xff]   ;;  %v6145_v10 = vld [vmem:[%s6694_s13 + $0x4a0] ss:$16 sps:$4 sm:$0xff]  }
 0x2ad   : > { %3969 = vmatprep.subr.bf16.mxu0 %v6063_v12  ;;  %4141 = vmatprep.subr.bf16.mxu1 %v6066_v13  ;;  %v6153_v12 = vld [vmem:[%s6694_s13 + $0x4c4] ss:$16 sps:$4 sm:$0xff]   ;;  %v6156_v13 = vld [vmem:[%s6694_s13 + $0x4cc] ss:$16 sps:$4 sm:$0xff]  }
 0x2b0   : > { %3970 = vmatpush1.bf16.msra.mxu0 %v6061_v14  ;;  %4142 = vmatpush1.bf16.msra.mxu1 %v6064_v19  ;;  %v6151_v14 = vld [vmem:[%s6694_s13 + $0x4c0] ss:$16 sps:$4 sm:$0xff]   ;;  %v6154_v19 = vld [vmem:[%s6694_s13 + $0x4c8] ss:$16 sps:$4 sm:$0xff]  }
 0x2b1   : > { %3971 = vmatprep.subr.bf16.mxu0 %v6069_v20  ;;  %4143 = vmatprep.subr.bf16.mxu1 %v6072_v15  ;;  %v6159_v20 = vld [vmem:[%s6694_s13 + $0x4e4] ss:$16 sps:$4 sm:$0xff]   ;;  %v6162_v15 = vld [vmem:[%s6694_s13 + $0x4ec] ss:$16 sps:$4 sm:$0xff]  }
 0x2b4   : > { %3972 = vmatpush1.bf16.msra.mxu0 %v6067_v16  ;;  %4144 = vmatpush1.bf16.msra.mxu1 %v6070_v21  ;;  %v6157_v16 = vld [vmem:[%s6694_s13 + $0x4e0] ss:$16 sps:$4 sm:$0xff]   ;;  %v6160_v21 = vld [vmem:[%s6694_s13 + $0x4e8] ss:$16 sps:$4 sm:$0xff]  }
 0x2b5   : > { %3973 = vmatprep.subr.bf16.mxu0 %v6075_v22  ;;  %4145 = vmatprep.subr.bf16.mxu1 %v6078_v23  ;;  %v6165_v22 = vld [vmem:[%s6694_s13 + $0x504] ss:$16 sps:$4 sm:$0xff]   ;;  %v6168_v23 = vld [vmem:[%s6694_s13 + $0x50c] ss:$16 sps:$4 sm:$0xff]  }
 0x2b8   : > { %3974 = vmatpush1.bf16.msra.mxu0 %v6073_v24  ;;  %4146 = vmatpush1.bf16.msra.mxu1 %v6076_v25  ;;  %v6163_v24 = vld [vmem:[%s6694_s13 + $0x500] ss:$16 sps:$4 sm:$0xff]   ;;  %v6166_v25 = vld [vmem:[%s6694_s13 + $0x508] ss:$16 sps:$4 sm:$0xff]  }
 0x2b9   : > { %3975 = vmatprep.subr.bf16.mxu0 %v6081_v26  ;;  %4147 = vmatprep.subr.bf16.mxu1 %v6084_v27  ;;  %v6171_v26 = vld [vmem:[%s6694_s13 + $0x524] ss:$16 sps:$4 sm:$0xff]   ;;  %v6174_v27 = vld [vmem:[%s6694_s13 + $0x52c] ss:$16 sps:$4 sm:$0xff]  }
 0x2bc   : > { %3976 = vmatpush1.bf16.msra.mxu0 %v6079_v28  ;;  %4148 = vmatpush1.bf16.msra.mxu1 %v6082_v29  ;;  %v6169_v28 = vld [vmem:[%s6694_s13 + $0x520] ss:$16 sps:$4 sm:$0xff]   ;;  %v6172_v29 = vld [vmem:[%s6694_s13 + $0x528] ss:$16 sps:$4 sm:$0xff]  }
 0x2bd   : > { %3977 = vmatprep.subr.bf16.mxu0 %v6087_v30  ;;  %4149 = vmatprep.subr.bf16.mxu1 %v6090_v31  ;;  %v6177_v30 = vld [vmem:[%s6694_s13 + $0x544] ss:$16 sps:$4 sm:$0xff]   ;;  %v6180_v31 = vld [vmem:[%s6694_s13 + $0x54c] ss:$16 sps:$4 sm:$0xff]  }
 0x2c0   : > { %3978 = vmatpush1.bf16.msra.mxu0 %v6085_v32  ;;  %4150 = vmatpush1.bf16.msra.mxu1 %v6088_v33  ;;  %v6175_v32 = vld [vmem:[%s6694_s13 + $0x540] ss:$16 sps:$4 sm:$0xff]   ;;  %v6178_v33 = vld [vmem:[%s6694_s13 + $0x548] ss:$16 sps:$4 sm:$0xff]  }
 0x2c1   : > { %3979 = vmatprep.subr.bf16.mxu0 %v6093_v17  ;;  %4151 = vmatprep.subr.bf16.mxu1 %v6096_v18  ;;  %v6183_v17 = vld [vmem:[%s6694_s13 + $0x564] ss:$16 sps:$4 sm:$0xff]   ;;  %v6186_v18 = vld [vmem:[%s6694_s13 + $0x56c] ss:$16 sps:$4 sm:$0xff]  }
 0x2c4   : > { %3980 = vmatpush1.bf16.msra.mxu0 %v6091_v34  ;;  %4152 = vmatpush1.bf16.msra.mxu1 %v6094_v35  ;;  %v6181_v34 = vld [vmem:[%s6694_s13 + $0x560] ss:$16 sps:$4 sm:$0xff]   ;;  %v6184_v35 = vld [vmem:[%s6694_s13 + $0x568] ss:$16 sps:$4 sm:$0xff]  }
 0x2c5   : > { %3981 = vmatprep.subr.bf16.mxu0 %v6099_v36  ;;  %4153 = vmatprep.subr.bf16.mxu1 %v6102_v37  ;;  %v6189_v36 = vld [vmem:[%s6694_s13 + $0x584] ss:$16 sps:$4 sm:$0xff]   ;;  %v6192_v37 = vld [vmem:[%s6694_s13 + $0x58c] ss:$16 sps:$4 sm:$0xff]  }
 0x2c8   : > { %3982 = vmatpush1.bf16.msra.mxu0 %v6097_v38  ;;  %4154 = vmatpush1.bf16.msra.mxu1 %v6100_v39  ;;  %v6187_v38 = vld [vmem:[%s6694_s13 + $0x580] ss:$16 sps:$4 sm:$0xff]   ;;  %v6190_v39 = vld [vmem:[%s6694_s13 + $0x588] ss:$16 sps:$4 sm:$0xff]  }
 0x2c9   : > { %3983 = vmatprep.subr.bf16.mxu0 %v6105_v40  ;;  %4155 = vmatprep.subr.bf16.mxu1 %v6108_v41  ;;  %v6195_v40 = vld [vmem:[%s6694_s13 + $0x5a4] ss:$16 sps:$4 sm:$0xff]   ;;  %v6198_v41 = vld [vmem:[%s6694_s13 + $0x5ac] ss:$16 sps:$4 sm:$0xff]  }
 0x2cc   : > { %3984 = vmatpush1.bf16.msra.mxu0 %v6103_v42  ;;  %4156 = vmatpush1.bf16.msra.mxu1 %v6106_v43  ;;  %v6193_v42 = vld [vmem:[%s6694_s13 + $0x5a0] ss:$16 sps:$4 sm:$0xff]   ;;  %v6196_v43 = vld [vmem:[%s6694_s13 + $0x5a8] ss:$16 sps:$4 sm:$0xff]  }
 0x2cd   : > { %3985 = vmatprep.subr.bf16.mxu0 %v6111_v44  ;;  %4157 = vmatprep.subr.bf16.mxu1 %v6114_v45  ;;  %v6201_v44 = vld [vmem:[%s6694_s13 + $0x5c4] ss:$16 sps:$4 sm:$0xff]   ;;  %v6204_v45 = vld [vmem:[%s6694_s13 + $0x5cc] ss:$16 sps:$4 sm:$0xff]  }
 0x2d0   : > { %3986 = vmatpush1.bf16.msra.mxu0 %v6109_v46  ;;  %4158 = vmatpush1.bf16.msra.mxu1 %v6112_v47  ;;  %v6199_v46 = vld [vmem:[%s6694_s13 + $0x5c0] ss:$16 sps:$4 sm:$0xff]   ;;  %v6202_v47 = vld [vmem:[%s6694_s13 + $0x5c8] ss:$16 sps:$4 sm:$0xff]  }
 0x2d1   : > { %3998 = vmatprep.subr.bf16.mxu0 %v6117_v48  ;;  %4170 = vmatprep.subr.bf16.mxu1 %v6120_v49  ;;  %v6207_v48 = vld [vmem:[%s6694_s13 + $0x5e4] ss:$16 sps:$4 sm:$0xff]   ;;  %v6210_v49 = vld [vmem:[%s6694_s13 + $0x5ec] ss:$16 sps:$4 sm:$0xff]  }
 0x2d3   : > { %3988 = vmatmul.mubr.bf16.vlgmr.msra.gmra.mrb[0].mxu0 %v5077_v50  ;;  %4160 = vmatmul.mubr.bf16.vlgmr.msra.gmra.mrb[0].mxu1 %v5077_v50  ;;  %v6205_v50 = vld [vmem:[%s6694_s13 + $0x5e0] ss:$16 sps:$4 sm:$0xff]  }
 0x2d4   : > { %3999 = vmatpush1.bf16.msra.mxu0 %v6115_v51  ;;  %4171 = vmatpush1.bf16.msra.mxu1 %v6118_v52  ;;  %v6208_v51 = vld [vmem:[%s6694_s13 + $0x5e8] ss:$16 sps:$4 sm:$0xff]   ;;  %v6213_v52 = vld [vmem:[%s6694_s13 + $0x604] ss:$16 sps:$4 sm:$0xff]  }
 0x2d5   : > { %4000 = vmatprep.subr.bf16.mxu0 %v6123_v53  ;;  %4172 = vmatprep.subr.bf16.mxu1 %v6126_v54  ;;  %v6216_v53 = vld [vmem:[%s6694_s13 + $0x60c] ss:$16 sps:$4 sm:$0xff]   ;;  %v5079_v54 = vcombine.low %v7180_v55, %v7185_v56  ;;  %v6219_v55 = vld [vmem:[%s6694_s13 + $0x624] ss:$16 sps:$4 sm:$0xff]  }
 0x2d6   : > { %4030 = vmatprep.mubr.bf16.mxu0 %v5080_v57  ;;  %4202 = vmatprep.mubr.bf16.mxu1 %v5080_v57  ;;  %v7254_v57 = vld [vmem:[%s7381_s1 + $0x18] sm:$0xff] }
 0x2d7   : > { %v6222_v56 = vld [vmem:[%s6694_s13 + $0x62c] ss:$16 sps:$4 sm:$0xff]  }
 0x2d8   : > { %4001 = vmatpush1.bf16.msra.mxu0 %v6121_v58  ;;  %4173 = vmatpush1.bf16.msra.mxu1 %v6124_v59  ;;  %v7259_v58 = vld [vmem:[%s7381_s1 + $0x38] sm:$0xff]  ;;  %v6211_v59 = vld [vmem:[%s6694_s13 + $0x600] ss:$16 sps:$4 sm:$0xff]  }
 0x2d9   : > { %4002 = vmatprep.subr.bf16.mxu0 %v6129_v60  ;;  %4174 = vmatprep.subr.bf16.mxu1 %v6132_v61  ;;  %v6214_v60 = vld [vmem:[%s6694_s13 + $0x608] ss:$16 sps:$4 sm:$0xff]   ;;  %v5082_v61 = vcombine.high %v7254_v57, %v7259_v58 }
 0x2dc   : > { %4003 = vmatpush1.bf16.msra.mxu0 %v6127_v62  ;;  %4175 = vmatpush1.bf16.msra.mxu1 %v6130_v63  ;;  %v6217_v62 = vld [vmem:[%s6694_s13 + $0x620] ss:$16 sps:$4 sm:$0xff]   ;;  %v6220_v63 = vld [vmem:[%s6694_s13 + $0x628] ss:$16 sps:$4 sm:$0xff]  }
 0x2dd   : > { %4004 = vmatprep.subr.bf16.mxu0 %v6135_v0  ;;  %4176 = vmatprep.subr.bf16.mxu1 %v6138_v1  ;;  %v6225_v0 = vld [vmem:[%s6694_s13 + $0x644] ss:$16 sps:$4 sm:$0xff]   ;;  %v6228_v1 = vld [vmem:[%s6694_s13 + $0x64c] ss:$16 sps:$4 sm:$0xff]  }
 0x2e0   : > { %4005 = vmatpush1.bf16.msra.mxu0 %v6133_v2  ;;  %4177 = vmatpush1.bf16.msra.mxu1 %v6136_v3  ;;  %v6223_v2 = vld [vmem:[%s6694_s13 + $0x640] ss:$16 sps:$4 sm:$0xff]   ;;  %v6226_v3 = vld [vmem:[%s6694_s13 + $0x648] ss:$16 sps:$4 sm:$0xff]  }
 0x2e1   : > { %4006 = vmatprep.subr.bf16.mxu0 %v6141_v4  ;;  %4178 = vmatprep.subr.bf16.mxu1 %v6144_v5  ;;  %v6231_v4 = vld [vmem:[%s6694_s13 + $0x664] ss:$16 sps:$4 sm:$0xff]   ;;  %v6234_v5 = vld [vmem:[%s6694_s13 + $0x66c] ss:$16 sps:$4 sm:$0xff]  }
 0x2e4   : > { %4007 = vmatpush1.bf16.msra.mxu0 %v6139_v6  ;;  %4179 = vmatpush1.bf16.msra.mxu1 %v6142_v7  ;;  %v6229_v6 = vld [vmem:[%s6694_s13 + $0x660] ss:$16 sps:$4 sm:$0xff]   ;;  %v6232_v7 = vld [vmem:[%s6694_s13 + $0x668] ss:$16 sps:$4 sm:$0xff]  }
 0x2e5   : > { %4008 = vmatprep.subr.bf16.mxu0 %v6147_v8  ;;  %4180 = vmatprep.subr.bf16.mxu1 %v6150_v9  ;;  %v6237_v8 = vld [vmem:[%s6694_s13 + $0x684] ss:$16 sps:$4 sm:$0xff]   ;;  %v6240_v9 = vld [vmem:[%s6694_s13 + $0x68c] ss:$16 sps:$4 sm:$0xff]  }
 0x2e8   : > { %4009 = vmatpush1.bf16.msra.mxu0 %v6145_v10  ;;  %4181 = vmatpush1.bf16.msra.mxu1 %v6148_v11  ;;  %v6235_v10 = vld [vmem:[%s6694_s13 + $0x680] ss:$16 sps:$4 sm:$0xff]   ;;  %v6238_v11 = vld [vmem:[%s6694_s13 + $0x688] ss:$16 sps:$4 sm:$0xff]  }
 0x2e9   : > { %4010 = vmatprep.subr.bf16.mxu0 %v6153_v12  ;;  %4182 = vmatprep.subr.bf16.mxu1 %v6156_v13  ;;  %v6243_v12 = vld [vmem:[%s6694_s13 + $0x6a4] ss:$16 sps:$4 sm:$0xff]   ;;  %v6246_v13 = vld [vmem:[%s6694_s13 + $0x6ac] ss:$16 sps:$4 sm:$0xff]  }
 0x2ec   : > { %4011 = vmatpush1.bf16.msra.mxu0 %v6151_v14  ;;  %4183 = vmatpush1.bf16.msra.mxu1 %v6154_v19  ;;  %v6241_v14 = vld [vmem:[%s6694_s13 + $0x6a0] ss:$16 sps:$4 sm:$0xff]   ;;  %v6244_v19 = vld [vmem:[%s6694_s13 + $0x6a8] ss:$16 sps:$4 sm:$0xff]  }
 0x2ed   : > { %4012 = vmatprep.subr.bf16.mxu0 %v6159_v20  ;;  %4184 = vmatprep.subr.bf16.mxu1 %v6162_v15  ;;  %v6249_v20 = vld [vmem:[%s6694_s13 + $0x6c4] ss:$16 sps:$4 sm:$0xff]   ;;  %v6252_v15 = vld [vmem:[%s6694_s13 + $0x6cc] ss:$16 sps:$4 sm:$0xff]  }
 0x2f0   : > { %4013 = vmatpush1.bf16.msra.mxu0 %v6157_v16  ;;  %4185 = vmatpush1.bf16.msra.mxu1 %v6160_v21  ;;  %v6247_v16 = vld [vmem:[%s6694_s13 + $0x6c0] ss:$16 sps:$4 sm:$0xff]   ;;  %v6250_v21 = vld [vmem:[%s6694_s13 + $0x6c8] ss:$16 sps:$4 sm:$0xff]  }
 0x2f1   : > { %4014 = vmatprep.subr.bf16.mxu0 %v6165_v22  ;;  %4186 = vmatprep.subr.bf16.mxu1 %v6168_v23  ;;  %v6255_v22 = vld [vmem:[%s6694_s13 + $0x6e4] ss:$16 sps:$4 sm:$0xff]   ;;  %v6258_v23 = vld [vmem:[%s6694_s13 + $0x6ec] ss:$16 sps:$4 sm:$0xff]  }
 0x2f4   : > { %4015 = vmatpush1.bf16.msra.mxu0 %v6163_v24  ;;  %4187 = vmatpush1.bf16.msra.mxu1 %v6166_v25  ;;  %v6253_v24 = vld [vmem:[%s6694_s13 + $0x6e0] ss:$16 sps:$4 sm:$0xff]   ;;  %v6256_v25 = vld [vmem:[%s6694_s13 + $0x6e8] ss:$16 sps:$4 sm:$0xff]  }
 0x2f5   : > { %4016 = vmatprep.subr.bf16.mxu0 %v6171_v26  ;;  %4188 = vmatprep.subr.bf16.mxu1 %v6174_v27  ;;  %v6261_v26 = vld [vmem:[%s6694_s13 + $0x704] ss:$16 sps:$4 sm:$0xff]   ;;  %v6264_v27 = vld [vmem:[%s6694_s13 + $0x70c] ss:$16 sps:$4 sm:$0xff]  }
 0x2f8   : > { %4017 = vmatpush1.bf16.msra.mxu0 %v6169_v28  ;;  %4189 = vmatpush1.bf16.msra.mxu1 %v6172_v29  ;;  %v6259_v28 = vld [vmem:[%s6694_s13 + $0x700] ss:$16 sps:$4 sm:$0xff]   ;;  %v6262_v29 = vld [vmem:[%s6694_s13 + $0x708] ss:$16 sps:$4 sm:$0xff]  }
 0x2f9   : > { %4018 = vmatprep.subr.bf16.mxu0 %v6177_v30  ;;  %4190 = vmatprep.subr.bf16.mxu1 %v6180_v31  ;;  %v6267_v30 = vld [vmem:[%s6694_s13 + $0x724] ss:$16 sps:$4 sm:$0xff]   ;;  %v6270_v31 = vld [vmem:[%s6694_s13 + $0x72c] ss:$16 sps:$4 sm:$0xff]  }
 0x2fc   : > { %4019 = vmatpush1.bf16.msra.mxu0 %v6175_v32  ;;  %4191 = vmatpush1.bf16.msra.mxu1 %v6178_v33  ;;  %v6265_v32 = vld [vmem:[%s6694_s13 + $0x720] ss:$16 sps:$4 sm:$0xff]   ;;  %v6268_v33 = vld [vmem:[%s6694_s13 + $0x728] ss:$16 sps:$4 sm:$0xff]  }
 0x2fd   : > { %4020 = vmatprep.subr.bf16.mxu0 %v6183_v17  ;;  %4192 = vmatprep.subr.bf16.mxu1 %v6186_v18  ;;  %v6273_v17 = vld [vmem:[%s6694_s13 + $0x744] ss:$16 sps:$4 sm:$0xff]   ;;  %v6276_v18 = vld [vmem:[%s6694_s13 + $0x74c] ss:$16 sps:$4 sm:$0xff]  }
 0x300   : > { %4021 = vmatpush1.bf16.msra.mxu0 %v6181_v34  ;;  %4193 = vmatpush1.bf16.msra.mxu1 %v6184_v35  ;;  %v6271_v34 = vld [vmem:[%s6694_s13 + $0x740] ss:$16 sps:$4 sm:$0xff]   ;;  %v6274_v35 = vld [vmem:[%s6694_s13 + $0x748] ss:$16 sps:$4 sm:$0xff]  }
 0x301   : > { %4022 = vmatprep.subr.bf16.mxu0 %v6189_v36  ;;  %4194 = vmatprep.subr.bf16.mxu1 %v6192_v37  ;;  %v6279_v36 = vld [vmem:[%s6694_s13 + $0x764] ss:$16 sps:$4 sm:$0xff]   ;;  %v6282_v37 = vld [vmem:[%s6694_s13 + $0x76c] ss:$16 sps:$4 sm:$0xff]  }
 0x304   : > { %4023 = vmatpush1.bf16.msra.mxu0 %v6187_v38  ;;  %4195 = vmatpush1.bf16.msra.mxu1 %v6190_v39  ;;  %v6277_v38 = vld [vmem:[%s6694_s13 + $0x760] ss:$16 sps:$4 sm:$0xff]   ;;  %v6280_v39 = vld [vmem:[%s6694_s13 + $0x768] ss:$16 sps:$4 sm:$0xff]  }
 0x305   : > { %4024 = vmatprep.subr.bf16.mxu0 %v6195_v40  ;;  %4196 = vmatprep.subr.bf16.mxu1 %v6198_v41  ;;  %v6285_v40 = vld [vmem:[%s6694_s13 + $0x784] ss:$16 sps:$4 sm:$0xff]   ;;  %v6288_v41 = vld [vmem:[%s6694_s13 + $0x78c] ss:$16 sps:$4 sm:$0xff]  }
 0x308   : > { %4025 = vmatpush1.bf16.msra.mxu0 %v6193_v42  ;;  %4197 = vmatpush1.bf16.msra.mxu1 %v6196_v43  ;;  %v6283_v42 = vld [vmem:[%s6694_s13 + $0x780] ss:$16 sps:$4 sm:$0xff]   ;;  %v6286_v43 = vld [vmem:[%s6694_s13 + $0x788] ss:$16 sps:$4 sm:$0xff]  }
 0x309   : > { %4026 = vmatprep.subr.bf16.mxu0 %v6201_v44  ;;  %4198 = vmatprep.subr.bf16.mxu1 %v6204_v45  ;;  %v6291_v44 = vld [vmem:[%s6694_s13 + $0x7a4] ss:$16 sps:$4 sm:$0xff]   ;;  %v6294_v45 = vld [vmem:[%s6694_s13 + $0x7ac] ss:$16 sps:$4 sm:$0xff]  }
 0x30c   : > { %4027 = vmatpush1.bf16.msra.mxu0 %v6199_v46  ;;  %4199 = vmatpush1.bf16.msra.mxu1 %v6202_v47  ;;  %v6289_v46 = vld [vmem:[%s6694_s13 + $0x7a0] ss:$16 sps:$4 sm:$0xff]   ;;  %v6292_v47 = vld [vmem:[%s6694_s13 + $0x7a8] ss:$16 sps:$4 sm:$0xff]  }
 0x30d   : > { %4028 = vmatprep.subr.bf16.mxu0 %v6207_v48  ;;  %4200 = vmatprep.subr.bf16.mxu1 %v6210_v49  ;;  %v6297_v48 = vld [vmem:[%s6694_s13 + $0x7c4] ss:$16 sps:$4 sm:$0xff]   ;;  %v6300_v49 = vld [vmem:[%s6694_s13 + $0x7cc] ss:$16 sps:$4 sm:$0xff]  }
 0x310   : > { %4029 = vmatpush1.bf16.msra.mxu0 %v6205_v50  ;;  %4201 = vmatpush1.bf16.msra.mxu1 %v6208_v51  ;;  %v6295_v50 = vld [vmem:[%s6694_s13 + $0x7c0] ss:$16 sps:$4 sm:$0xff]   ;;  %v6298_v51 = vld [vmem:[%s6694_s13 + $0x7c8] ss:$16 sps:$4 sm:$0xff]  }
 0x311   : > { %4041 = vmatprep.subr.bf16.mxu0 %v6213_v52  ;;  %4213 = vmatprep.subr.bf16.mxu1 %v6216_v53  ;;  %v6303_v52 = vld [vmem:[%s6694_s13 + $0x7e4] ss:$16 sps:$4 sm:$0xff]   ;;  %v6306_v53 = vld [vmem:[%s6694_s13 + $0x7ec] ss:$16 sps:$4 sm:$0xff]  }
 0x313   : > { %4031 = vmatmul.mubr.bf16.vlgmr.msra.gmra.mrb[0].mxu0 %v5079_v54  ;;  %4203 = vmatmul.mubr.bf16.vlgmr.msra.gmra.mrb[0].mxu1 %v5079_v54  ;;  %v6301_v54 = vld [vmem:[%s6694_s13 + $0x7e0] ss:$16 sps:$4 sm:$0xff]  }
 0x314   : > { %4042 = vmatpush1.bf16.msra.mxu0 %v6211_v59  ;;  %4214 = vmatpush1.bf16.msra.mxu1 %v6214_v60  ;;  %v6304_v59 = vld [vmem:[%s6694_s13 + $0x7e8] ss:$16 sps:$4 sm:$0xff]   ;;  %v5081_v60 = vcombine.low %v7254_v57, %v7259_v58 }
 0x315   : > { %4043 = vmatprep.subr.bf16.mxu0 %v6219_v55  ;;  %4215 = vmatprep.subr.bf16.mxu1 %v6222_v56  ;;  %v2316_v55 = vld [vmem:[#allocation2] sm:$0xff]  ;;  %v2318_v56 = vld [vmem:[#allocation2 + $0x10] sm:$0xff] }
 0x316   : > { %4073 = vmatprep.mubr.bf16.mxu0 %v5082_v61  ;;  %4245 = vmatprep.mubr.bf16.mxu1 %v5082_v61  ;;  %v2317_v61 = vld [vmem:[#allocation2 + $0x8] sm:$0xff] }
 0x318   : > { %4044 = vmatpush1.bf16.msra.mxu0 %v6217_v62  ;;  %4216 = vmatpush1.bf16.msra.mxu1 %v6220_v63  ;;  %v2319_v62 = vld [vmem:[#allocation2 + $0x18] sm:$0xff] }
 0x319   : > { %4045 = vmatprep.subr.bf16.mxu0 %v6225_v0  ;;  %4217 = vmatprep.subr.bf16.mxu1 %v6228_v1  ;;  %v2320_v1 = vld [vmem:[#allocation2 + $0x20] sm:$0xff] }
 0x31c   : > { %4046 = vmatpush1.bf16.msra.mxu0 %v6223_v2  ;;  %4218 = vmatpush1.bf16.msra.mxu1 %v6226_v3  ;;  %v2322_v2 = vld [vmem:[#allocation2 + $0x30] sm:$0xff] }
 0x31d   : > { %4047 = vmatprep.subr.bf16.mxu0 %v6231_v4  ;;  %4219 = vmatprep.subr.bf16.mxu1 %v6234_v5 }
 0x320   : > { %4048 = vmatpush1.bf16.msra.mxu0 %v6229_v6  ;;  %4220 = vmatpush1.bf16.msra.mxu1 %v6232_v7  ;;  %v2321_v7 = vld [vmem:[#allocation2 + $0x28] sm:$0xff] }
 0x321   : > { %4049 = vmatprep.subr.bf16.mxu0 %v6237_v8  ;;  %4221 = vmatprep.subr.bf16.mxu1 %v6240_v9  ;;  %v2323_v8 = vld [vmem:[#allocation2 + $0x38] sm:$0xff] }
 0x324   : > { %4050 = vmatpush1.bf16.msra.mxu0 %v6235_v10  ;;  %4222 = vmatpush1.bf16.msra.mxu1 %v6238_v11 }
 0x325   : > { %4051 = vmatprep.subr.bf16.mxu0 %v6243_v12  ;;  %4223 = vmatprep.subr.bf16.mxu1 %v6246_v13 }
 0x328   : > { %4052 = vmatpush1.bf16.msra.mxu0 %v6241_v14  ;;  %4224 = vmatpush1.bf16.msra.mxu1 %v6244_v19 }
 0x329   : > { %4053 = vmatprep.subr.bf16.mxu0 %v6249_v20  ;;  %4225 = vmatprep.subr.bf16.mxu1 %v6252_v15 }
 0x32c   : > { %4054 = vmatpush1.bf16.msra.mxu0 %v6247_v16  ;;  %4226 = vmatpush1.bf16.msra.mxu1 %v6250_v21 }
 0x32d   : > { %4055 = vmatprep.subr.bf16.mxu0 %v6255_v22  ;;  %4227 = vmatprep.subr.bf16.mxu1 %v6258_v23 }
 0x330   : > { %4056 = vmatpush1.bf16.msra.mxu0 %v6253_v24  ;;  %4228 = vmatpush1.bf16.msra.mxu1 %v6256_v25 }
 0x331   : > { %4057 = vmatprep.subr.bf16.mxu0 %v6261_v26  ;;  %4229 = vmatprep.subr.bf16.mxu1 %v6264_v27 }
 0x334   : > { %4058 = vmatpush1.bf16.msra.mxu0 %v6259_v28  ;;  %4230 = vmatpush1.bf16.msra.mxu1 %v6262_v29 }
 0x335   : > { %4059 = vmatprep.subr.bf16.mxu0 %v6267_v30  ;;  %4231 = vmatprep.subr.bf16.mxu1 %v6270_v31 }
 0x338   : > { %4060 = vmatpush1.bf16.msra.mxu0 %v6265_v32  ;;  %4232 = vmatpush1.bf16.msra.mxu1 %v6268_v33 }
 0x339   : > { %4061 = vmatprep.subr.bf16.mxu0 %v6273_v17  ;;  %4233 = vmatprep.subr.bf16.mxu1 %v6276_v18 }
 0x33c   : > { %4062 = vmatpush1.bf16.msra.mxu0 %v6271_v34  ;;  %4234 = vmatpush1.bf16.msra.mxu1 %v6274_v35 }
 0x33d   : > { %4063 = vmatprep.subr.bf16.mxu0 %v6279_v36  ;;  %4235 = vmatprep.subr.bf16.mxu1 %v6282_v37 }
 0x340   : > { %4064 = vmatpush1.bf16.msra.mxu0 %v6277_v38  ;;  %4236 = vmatpush1.bf16.msra.mxu1 %v6280_v39 }
 0x341   : > { %4065 = vmatprep.subr.bf16.mxu0 %v6285_v40  ;;  %4237 = vmatprep.subr.bf16.mxu1 %v6288_v41 }
 0x344   : > { %4066 = vmatpush1.bf16.msra.mxu0 %v6283_v42  ;;  %4238 = vmatpush1.bf16.msra.mxu1 %v6286_v43 }
 0x345   : > { %4067 = vmatprep.subr.bf16.mxu0 %v6291_v44  ;;  %4239 = vmatprep.subr.bf16.mxu1 %v6294_v45 }
 0x348   : > { %4068 = vmatpush1.bf16.msra.mxu0 %v6289_v46  ;;  %4240 = vmatpush1.bf16.msra.mxu1 %v6292_v47 }
 0x349   : > { %4069 = vmatprep.subr.bf16.mxu0 %v6297_v48  ;;  %4241 = vmatprep.subr.bf16.mxu1 %v6300_v49 }
 0x34c   : > { %4070 = vmatpush1.bf16.msra.mxu0 %v6295_v50  ;;  %4242 = vmatpush1.bf16.msra.mxu1 %v6298_v51 }
 0x34d   : > { %4071 = vmatprep.subr.bf16.mxu0 %v6303_v52  ;;  %4243 = vmatprep.subr.bf16.mxu1 %v6306_v53 }
 0x350   : > { %4072 = vmatpush1.bf16.msra.mxu0 %v6301_v54  ;;  %4244 = vmatpush1.bf16.msra.mxu1 %v6304_v59 }
 0x353   : > { %4074 = vmatmul.mubr.bf16.vlgmr.msra.gmra.mrb[0].mxu0 %v5081_v60  ;;  %4246 = vmatmul.mubr.bf16.vlgmr.msra.gmra.mrb[0].mxu1 %v5081_v60 }
 0x426   : > { %v4075_v63 = vpop.f32.mrb[0].mxu0  ;;  %v4247_v0 = vpop.f32.mrb[0].mxu1 }
 0x427   : > { %v4256_v3 = vadd.f32 %v4075_v63, %v2316_v55  ;;  %v4258_v4 = vadd.f32 %v4247_v0, %v2318_v56  ;;  %v4077_v5 = vpop.f32.mrb[1].mxu0  ;;  %v4249_v6 = vpop.f32.mrb[1].mxu1 }
 0x428   : > { %v4257_v9 = vadd.f32 %v4077_v5, %v2317_v61  ;;  %v4259_v57 = vadd.f32 %v4249_v6, %v2319_v62  ;;  %v4079_v58 = vpop.f32.mrb[2].mxu0  ;;  %v4251_v10 = vpop.f32.mrb[2].mxu1 }
 0x429   : > { %4264 = vst [vmem:[#allocation2] sm:$0xff] %v4256_v3  ;;  %4266 = vst [vmem:[#allocation2 + $0x10] sm:$0xff] %v4258_v4  ;;  %v4260_v11 = vadd.f32 %v4079_v58, %v2320_v1  ;;  %v4262_v12 = vadd.f32 %v4251_v10, %v2322_v2  ;;  %v4081_v13 = vpop.f32.mrb[3].mxu0  ;;  %v4253_v14 = vpop.f32.mrb[3].mxu1 }
 0x42a   : > { %4265 = vst [vmem:[#allocation2 + $0x8] sm:$0xff] %v4257_v9  ;;  %4267 = vst [vmem:[#allocation2 + $0x18] sm:$0xff] %v4259_v57  ;;  %v4261_v19 = vadd.f32 %v4081_v13, %v2321_v7  ;;  %v4263_v20 = vadd.f32 %v4253_v14, %v2323_v8 }
 0x42b   : > { %4268 = vst [vmem:[#allocation2 + $0x20] sm:$0xff] %v4260_v11  ;;  %4270 = vst [vmem:[#allocation2 + $0x30] sm:$0xff] %v4262_v12 }
 0x42c   : > { %4269 = vst [vmem:[#allocation2 + $0x28] sm:$0xff] %v4261_v19  ;;  %4271 = vst [vmem:[#allocation2 + $0x38] sm:$0xff] %v4263_v20 }
 0x42d PF: > { %v6307_v15 = vld [vmem:[%s6715_s8 + $0x40] sm:$0xff]   ;;  %v6311_v23 = vld [vmem:[%s6715_s8 + $0x48] sm:$0xff]   ;;  %v6315_v27 = vld [vmem:[%s6715_s8 + $0x50] sm:$0xff]   ;;  %v4285_v36 = vlaneseq }
 0x42e   : > { %v6308_v16 = vld [vmem:[%s6715_s8 + $0xc0] sm:$0xff]   ;;  %5377 = vmatprep.subr.bf16.mxu0 %v6307_v15  ;;  %v6312_v24 = vld [vmem:[%s6715_s8 + $0xc8] sm:$0xff]   ;;  %v6316_v28 = vld [vmem:[%s6715_s8 + $0xd0] sm:$0xff]  }
 0x42f   : > { %v6309_v21 = vld [vmem:[%s6715_s8] sm:$0xff]   ;;  %5399 = vmatprep.subr.bf16.mxu1 %v6308_v16  ;;  %v6313_v25 = vld [vmem:[%s6715_s8 + $0x8] sm:$0xff]   ;;  %v6317_v29 = vld [vmem:[%s6715_s8 + $0x10] sm:$0xff]   ;;  %v4286_v41 = vshrl.u32 %v4285_v36, 7 }
 0x430   : > { %v6310_v22 = vld [vmem:[%s6715_s8 + $0x80] sm:$0xff]   ;;  %5378 = vmatpush3.bf16.msra.mxu0 %v6309_v21  ;;  %v6314_v26 = vld [vmem:[%s6715_s8 + $0x88] sm:$0xff]   ;;  %v6318_v30 = vld [vmem:[%s6715_s8 + $0x90] sm:$0xff]  }
 0x431   : > { %5400 = vmatpush3.bf16.msra.mxu1 %v6310_v22  ;;  %5379 = vmatprep.subr.bf16.mxu0 %v6311_v23  ;;  %v6319_v31 = vld [vmem:[%s6715_s8 + $0x58] sm:$0xff]   ;;  %v6323_v18 = vld [vmem:[%s6715_s8 + $0x60] sm:$0xff]   ;;  %v6327_v38 = vld [vmem:[%s6715_s8 + $0x68] sm:$0xff]   ;;  %v4291_v46 = vsub.s32 1, %v4286_v41  ;;  %v4299_v48 = vsub.s32 3, %v4286_v41  ;;  %v4287_v50 = vsub.s32 0, %v4286_v41 }
 0x432   : > { %5401 = vmatprep.subr.bf16.mxu1 %v6312_v24  ;;  %v6320_v32 = vld [vmem:[%s6715_s8 + $0xd8] sm:$0xff]   ;;  %v6324_v34 = vld [vmem:[%s6715_s8 + $0xe0] sm:$0xff]   ;;  %v6328_v39 = vld [vmem:[%s6715_s8 + $0xe8] sm:$0xff]   ;;  %v4295_v52 = vsub.s32 2, %v4286_v41 }
 0x433   : > { %v6321_v33 = vld [vmem:[%s6715_s8 + $0x18] sm:$0xff]   ;;  %v6325_v35 = vld [vmem:[%s6715_s8 + $0x20] sm:$0xff]   ;;  %v6329_v40 = vld [vmem:[%s6715_s8 + $0x28] sm:$0xff]  }
 0x434   : > { %5380 = vmatpush3.bf16.msra.mxu0 %v6313_v25  ;;  %v6322_v17 = vld [vmem:[%s6715_s8 + $0x98] sm:$0xff]   ;;  %v6326_v37 = vld [vmem:[%s6715_s8 + $0xa0] sm:$0xff]   ;;  %v6330_v42 = vld [vmem:[%s6715_s8 + $0xa8] sm:$0xff]  }
 0x435   : > { %5402 = vmatpush3.bf16.msra.mxu1 %v6314_v26  ;;  %5381 = vmatprep.subr.bf16.mxu0 %v6315_v27  ;;  %v6331_v43 = vld [vmem:[%s6715_s8 + $0x70] sm:$0xff]   ;;  %v6335_v49 = vld [vmem:[%s6715_s8 + $0x78] sm:$0xff]   ;;  %v4276_v59 = vld [vmem:[#allocation2 + $0x8] sm:$0xff] }
 0x436   : > { %5403 = vmatprep.subr.bf16.mxu1 %v6316_v28  ;;  %v6332_v44 = vld [vmem:[%s6715_s8 + $0xf0] sm:$0xff]   ;;  %v6336_v51 = vld [vmem:[%s6715_s8 + $0xf8] sm:$0xff]   ;;  %v4280_v60 = vld [vmem:[#allocation2 + $0x28] sm:$0xff] }
 0x437   : > { %v6333_v45 = vld [vmem:[%s6715_s8 + $0x30] sm:$0xff]   ;;  %v6337_v53 = vld [vmem:[%s6715_s8 + $0x38] sm:$0xff]   ;;  %v4277_v4 = vld [vmem:[#allocation2 + $0x10] sm:$0xff] }
 0x438   : > { %5382 = vmatpush3.bf16.msra.mxu0 %v6317_v29  ;;  %v6334_v47 = vld [vmem:[%s6715_s8 + $0xb0] sm:$0xff]   ;;  %v6338_v54 = vld [vmem:[%s6715_s8 + $0xb8] sm:$0xff]   ;;  %v4281_v5 = vld [vmem:[#allocation2 + $0x30] sm:$0xff] }
 0x439   : > { %5404 = vmatpush3.bf16.msra.mxu1 %v6318_v30  ;;  %5383 = vmatprep.subr.bf16.mxu0 %v6319_v31  ;;  %v4283_v55 = vld [vmem:[%s6702_s17] sm:$0xf]  ;;  %v4278_v61 = vld [vmem:[#allocation2 + $0x18] sm:$0xff] }
 0x43a   : > { %5405 = vmatprep.subr.bf16.mxu1 %v6320_v32  ;;  %v4292_v56 = vrot.slane %v4283_v55, %v4291_v46  ;;  %v4282_v62 = vld [vmem:[#allocation2 + $0x38] sm:$0xff]  ;;  %v4300_v63 = vrot.slane %v4283_v55, %v4299_v48  ;;  %v4275_v0 = vld [vmem:[#allocation2] sm:$0xff]  ;;  %v4288_v1 = vrot.slane %v4283_v55, %v4287_v50  ;;  %v4296_v2 = vrot.slane %v4283_v55, %v4295_v52 }
 0x43b   : > { %v4279_v3 = vld [vmem:[#allocation2 + $0x20] sm:$0xff] }
 0x43c   : > { %5384 = vmatpush3.bf16.msra.mxu0 %v6321_v33  ;;  %v4306_v6 = vadd.f32 %v4292_v56, %v4276_v59  ;;  %v4310_v7 = vadd.f32 %v4292_v56, %v4280_v60  ;;  %v4308_v8 = vadd.f32 %v4300_v63, %v4278_v61  ;;  %v4312_v9 = vadd.f32 %v4300_v63, %v4282_v62 }
 0x43d   : > { %5406 = vmatpush3.bf16.msra.mxu1 %v6322_v17  ;;  %5385 = vmatprep.subr.bf16.mxu0 %v6323_v18  ;;  %v4305_v57 = vadd.f32 %v4288_v1, %v4275_v0  ;;  %v4309_v58 = vadd.f32 %v4288_v1, %v4279_v3  ;;  %v4307_v10 = vadd.f32 %v4296_v2, %v4277_v4 }
 0x43e   : > { %5407 = vmatprep.subr.bf16.mxu1 %v6324_v34  ;;  %v4311_v11 = vadd.f32 %v4296_v2, %v4281_v5  ;;  %v4314_v12 = vmax.f32 %v4306_v6, 0.0  ;;  %v4318_v13 = vmax.f32 %v4310_v7, 0.0  ;;  %v4316_v14 = vmax.f32 %v4308_v8, 0.0 }
 0x43f   : > { %v4320_v19 = vmax.f32 %v4312_v9, 0.0  ;;  %v4313_v20 = vmax.f32 %v4305_v57, 0.0  ;;  %v4317_v15 = vmax.f32 %v4309_v58, 0.0  ;;  %v4315_v16 = vmax.f32 %v4307_v10, 0.0 }
 0x440   : > { %5386 = vmatpush3.bf16.msra.mxu0 %v6325_v35  ;;  %v4319_v21 = vmax.f32 %v4311_v11, 0.0  ;;  %v4322_v22 = vpack.c.bf16 %v4318_v13, %v4314_v12 }
 0x441   : > { %5408 = vmatpush3.bf16.msra.mxu1 %v6326_v37  ;;  %5387 = vmatprep.subr.bf16.mxu0 %v6327_v38  ;;  %v4324_v23 = vpack.c.bf16 %v4320_v19, %v4316_v14  ;;  %v4321_v24 = vpack.c.bf16 %v4317_v15, %v4313_v20 }
 0x442   : > { %5409 = vmatprep.subr.bf16.mxu1 %v6328_v39  ;;  %v4323_v25 = vpack.c.bf16 %v4319_v21, %v4315_v16  ;;  %4613 = vmatprep.mubr.bf16.mxu0 %v4322_v22 }
 0x443   : > { %4654 = vmatprep.mubr.bf16.mxu1 %v4324_v23 }
 0x444   : > { %5388 = vmatpush3.bf16.msra.mxu0 %v6329_v40 }
 0x445   : > { %5410 = vmatpush3.bf16.msra.mxu1 %v6330_v42  ;;  %5389 = vmatprep.subr.bf16.mxu0 %v6331_v43 }
 0x446   : > { %5411 = vmatprep.subr.bf16.mxu1 %v6332_v44 }
 0x448   : > { %5390 = vmatpush3.bf16.msra.mxu0 %v6333_v45 }
 0x449   : > { %5412 = vmatpush3.bf16.msra.mxu1 %v6334_v47  ;;  %5391 = vmatprep.subr.bf16.mxu0 %v6335_v49 }
 0x44a   : > { %5413 = vmatprep.subr.bf16.mxu1 %v6336_v51 }
 0x44c   : > { %5392 = vmatpush3.bf16.msra.mxu0 %v6337_v53 }
 0x44d   : > { %5414 = vmatpush3.bf16.msra.mxu1 %v6338_v54 }
 0x44f   : > { %4614 = vmatmul.mubr.bf16.vlgmr.msra.gmra.mrb[0].mxu0 %v4321_v24 }
 0x450   : > { %4655 = vmatmul.mubr.bf16.vlgmr.msra.gmra.mrb[0].mxu1 %v4323_v25 }
 0x522   : > { %v5393_v26 = vpop.f32.mrb[0].mxu0 }
 0x523   : > { %v5415_v27 = vpop.f32.mrb[0].mxu1  ;;  %v5394_v28 = vpop.f32.mrb[1].mxu0 }
 0x524   : > { %v5416_v29 = vpop.f32.mrb[1].mxu1  ;;  %v5395_v30 = vadd.f32 %v5394_v28, %v5393_v26  ;;  %v5396_v32 = vpop.f32.mrb[2].mxu0 }
 0x525   : > { %v5417_v31 = vadd.f32 %v5416_v29, %v5415_v27  ;;  %v5418_v33 = vpop.f32.mrb[2].mxu1  ;;  %v5397_v17 = vpop.f32.mrb[3].mxu0 }
 0x526   : > { %v5419_v18 = vpop.f32.mrb[3].mxu1  ;;  %v5398_v35 = vadd.f32 %v5397_v17, %v5396_v32 }
 0x527   : > { %v4657_v34 = vadd.f32 %v5417_v31, %v5395_v30  ;;  %v5420_v36 = vadd.f32 %v5419_v18, %v5418_v33 }
 0x529   : > { %4663 = vst [vmem:[%s6713_s28] sm:$0xff] %v4657_v34  ;;  %v4660_v37 = vadd.f32 %v5420_v36, %v5398_v35 }
 0x52b   : > { %4664 = vst [vmem:[%s6713_s28 + $0x8] sm:$0xff] %v4660_v37 }
 0x52c PF: > { %s21_s23 = sadd.s32 1, %s6483_s23   ;;  %s7397_s18 = smov %s6467_s19 }
 0x52d   : > { %p18_p2 = scmp.ge.s32.totalorder %s21_s23, 4   ;;  %s7398_s19 = smov %s6471_s20 }
 0x52e   : > { %s7399_s20 = smov %s6570_s29  ;;  %s7400_s21 = smov %s6479_s22 }
 0x52f   : > { %s7401_s22 = smov %s7403_s25  ;;  %20 = sbr.rel (!%p18_p2) target bundleno = 8 (0x8), region = 122 }
 0x536   :  { %4686 = vsyncpa [#allocation4], 1 }
 0x537   :  { %4688 = vsyncpa [#allocation4 + $0x1], 1 }
 0x538   :  { %4689 = vsyncpa [#allocation6], 1 }
 0x539   :  { %4691 = vsyncpa [#allocation6 + $0x1], 1 }

</bundles_post_ra>
